<compile_context>
chip_gen: v7x
topology: tpu7x:2x2x1
jax: 0.10.0
libtpu: 0.0.40
codegen_flags: <defaults>
</compile_context>

<pallas_src>
import functools

import jax
import jax.numpy as jnp
from jax.experimental import pallas as pl
from jax.experimental.pallas import tpu as pltpu


def _round_up(x, m):
    return ((x + m - 1) // m) * m


# ----------------------------------------------------------------------------
# Plain-JAX glue: sampling / grouping (data-dependent gathers).
# ----------------------------------------------------------------------------
def square_distance(src, dst):
    # src (B,N,3), dst (B,M,3) -> (B,N,M)
    dist = -2.0 * jnp.einsum("bnc,bmc->bnm", src, dst)
    dist += jnp.sum(src ** 2, -1)[:, :, None]
    dist += jnp.sum(dst ** 2, -1)[:, None, :]
    return dist


def farthest_point_sampling(xyz, npoint):
    # TODO(synk): PyTorch seeds FPS with torch.randint; we start at index 0
    # deterministically (same algorithm otherwise).
    B, N, _ = xyz.shape

    def body(i, state):
        centroids, distance, farthest = state
        centroids = centroids.at[:, i].set(farthest)
        centroid = jnp.take_along_axis(xyz, farthest[:, None, None], axis=1)  # (B,1,3)
        dist = jnp.sum((xyz - centroid) ** 2, -1)
        distance = jnp.minimum(distance, dist)
        farthest = jnp.argmax(distance, axis=-1).astype(jnp.int32)
        return centroids, distance, farthest

    init = (jnp.zeros((B, npoint), jnp.int32),
            jnp.full((B, N), 1e10, jnp.float32),
            jnp.zeros((B,), jnp.int32))
    centroids, _, _ = jax.lax.fori_loop(0, npoint, body, init)
    return centroids


def index_points(points, idx):
    # points (B,N,C), idx (B,...) -> (B,...,C)
    B = points.shape[0]
    batch_idx = jnp.arange(B).reshape((B,) + (1,) * (idx.ndim - 1))
    return points[batch_idx, idx]


def query_ball_point(radius, nsample, xyz, new_xyz):
    # TODO(synk): PyTorch randomly subsamples / pads in-ball indices; we
    # deterministically take the nsample lowest-index in-ball points and pad
    # with the first one (same ball semantics).
    B, N, _ = xyz.shape
    sqrdists = square_distance(new_xyz, xyz)                        # (B,S,N)
    in_ball = sqrdists <= radius ** 2
    # lax.top_k (k = nsample) over integer scores ranking in-ball points by
    # ascending index; much cheaper than a full O(N log N) sort over N.
    scores = jnp.where(in_ball, N - jnp.arange(N, dtype=jnp.int32), -1)
    vals, pos = jax.lax.top_k(scores, nsample)                      # (B,S,nsample)
    group_idx = jnp.where(vals > 0, pos.astype(jnp.int32), N)
    first = group_idx[:, :, :1]
    first = jnp.where(first == N, 0, first)
    group_idx = jnp.where(group_idx == N, first, group_idx)
    return group_idx


# ----------------------------------------------------------------------------
# Pallas kernel: fused (1x1 conv -> BN(eval, folded) -> ReLU) x L + max over K.
#
# x_ref:  (K, Cin, TG) bf16 -- neighbor-major, channels on sublanes, TG groups
#                              on the lane axis (TG % 128 == 0).
# refs:   (w0, b0, w1, b1, ..., o_ref); w_l bf16 (C_{l+1}, C_l) with BN scale
#         folded, b_l f32 (C_{l+1}, 1); o_ref f32 (C_out, TG).
# ----------------------------------------------------------------------------
def _sa_mlp_kernel(x_ref, *refs):
    o_ref = refs[-1]
    num_layers = (len(refs) - 1) // 2
    k_tot = x_ref.shape[0]

    ws = [refs[2 * l][...] for l in range(num_layers)]       # bf16, small, hoisted
    bs = [refs[2 * l + 1][...] for l in range(num_layers)]   # f32 (C,1)

    pooled = None
    for k in range(k_tot):                                   # static unrolled loop
        h = x_ref[k]                                         # (Cin, TG) bf16, lane-dense
        for l in range(num_layers):
            acc = jnp.dot(ws[l], h, preferred_element_type=jnp.float32)  # MXU, f32 acc
            act = jnp.maximum(acc + bs[l], 0.0)              # f32 bias + ReLU epilogue
            h = act.astype(jnp.bfloat16) if l + 1 < num_layers else act
        pooled = h if pooled is None else jnp.maximum(pooled, h)   # running max over K
    o_ref[...] = pooled                                      # (C_out, TG) lane-dense store


def _default_vmem_limit():
    # ~75% of physical VMEM: ~48 MiB on v7x (64 MiB), ~96 MiB on v5e/v6e (128 MiB).
    try:
        cap = pltpu.get_tpu_info().vmem_capacity_bytes
        return int(min(cap * 0.75, 100 * 1024 * 1024))
    except Exception:
        return 48 * 1024 * 1024


def set_abstraction_mlp(feats_kcf, weights, biases, *, tg=512):
    """feats_kcf: (K, Cin, G) bf16.  weights[l]: bf16 (C_{l+1}, C_l) with BN scale
    folded.  biases[l]: f32 (C_{l+1},).  Returns (C_out, G) f32."""
    K, Cin, G = feats_kcf.shape
    C_out = weights[-1].shape[0]
    c_max = max(w.shape[0] for w in weights)

    vmem_limit = _default_vmem_limit()
    budget = int(vmem_limit * 0.8)

    g_pad128 = _round_up(G, 128)
    tg_eff = min(_round_up(tg, 128), g_pad128)

    def step_bytes(t):
        b = 2 * K * Cin * t * 2                    # double-buffered bf16 input block
        b += 2 * C_out * t * 4                     # double-buffered f32 output block
        b += t * (c_max * 6 + C_out * 4 + Cin * 2)  # live acts: f32 acc + bf16 + running max
        return b

    while tg_eff > 128 and step_bytes(tg_eff) > budget:
        tg_eff -= 128
    # Prefer >= 2 grid steps so the "parallel" axis can shard across v7x's two TCs.
    if tg_eff >= g_pad128 and g_pad128 >= 256:
        tg_eff = max(128, (g_pad128 // 2) // 128 * 128)

    g_pad = _round_up(G, tg_eff)
    if g_pad != G:
        # Zero-padded groups produce ReLU(bias) garbage columns; sliced off below.
        feats_kcf = jnp.pad(feats_kcf, ((0, 0), (0, 0), (0, g_pad - G)))

    in_specs = [pl.BlockSpec((K, Cin, tg_eff), lambda g: (0, 0, g))]
    args = [feats_kcf]
    for w, b in zip(weights, biases):
        in_specs.append(pl.BlockSpec(w.shape, lambda g: (0, 0)))
        in_specs.append(pl.BlockSpec((w.shape[0], 1), lambda g: (0, 0)))
        args += [w, b.reshape(-1, 1)]

    out = pl.pallas_call(
        _sa_mlp_kernel,
        out_shape=jax.ShapeDtypeStruct((C_out, g_pad), jnp.float32),
        grid=(g_pad // tg_eff,),
        in_specs=in_specs,
        out_specs=pl.BlockSpec((C_out, tg_eff), lambda g: (0, g)),
        compiler_params=pltpu.CompilerParams(
            dimension_semantics=("parallel",),
            vmem_limit_bytes=vmem_limit,
        ),
    )(*args)
    return out[:, :G]                              # (C_out, G)


# ----------------------------------------------------------------------------
# Module wrapper with deterministic parameter init.
# ----------------------------------------------------------------------------
class PointNetSetAbstractionPallas:
    def __init__(self, npoint, radius, nsample, in_channel, mlp_channels, key, tg=512):
        self.npoint, self.radius, self.nsample, self.tg = npoint, radius, nsample, tg
        eps = 1e-5
        last = in_channel + 3
        self.weights, self.biases = [], []
        for out in mlp_channels:
            key, k1, k2, k3 = jax.random.split(key, 4)
            # Conv2d(last, out, kernel=1, bias=False): weight (out, last, 1, 1)
            bound = 1.0 / (last ** 0.5)
            w = jax.random.uniform(k1, (out, last), jnp.float32, -bound, bound)
            # TODO(synk): BatchNorm2d applied in eval mode with running stats
            # (mean=0, var=1); training-mode batch statistics are not computed.
            gamma = jax.random.uniform(k2, (out,), jnp.float32, 0.5, 1.5)
            beta = jax.random.uniform(k3, (out,), jnp.float32, -0.1, 0.1)
            running_mean = jnp.zeros((out,), jnp.float32)
            running_var = jnp.ones((out,), jnp.float32)
            scale = gamma / jnp.sqrt(running_var + eps)
            bias = beta - running_mean * scale
            # channels-first matmul: (scale * W) @ x; fold BN scale into weight rows.
            self.weights.append((w * scale[:, None]).astype(jnp.bfloat16))   # (out, last)
            self.biases.append(bias.astype(jnp.float32))
            last = out
        self.c_out = last

    def __call__(self, xyz, points=None):
        B, N, _ = xyz.shape
        S, K = self.npoint, self.nsample
        fps_idx = farthest_point_sampling(xyz, S)
        new_xyz = index_points(xyz, fps_idx)                              # (B,S,3)
        idx = query_ball_point(self.radius, K, xyz, new_xyz)              # (B,S,K)
        grouped_xyz = index_points(xyz, idx) - new_xyz[:, :, None, :]     # (B,S,K,3)
        if points is not None:
            # points: (B, C, N) as in PyTorch (permuted before gather there)
            grouped_pts = index_points(jnp.transpose(points, (0, 2, 1)), idx)
            feats = jnp.concatenate([grouped_xyz, grouped_pts], axis=-1)  # (B,S,K,3+C)
        else:
            feats = grouped_xyz
        cin = feats.shape[-1]
        # Single relayout + cast pass into the kernel layout:
        # (B,S,K,C) -> (K, C, B*S) bf16 (neighbors untiled, channels on sublanes,
        # groups on lanes).  No Cin / K padding passes needed.
        feats_kcf = (jnp.transpose(feats, (2, 3, 0, 1))
                     .reshape(K, cin, B * S).astype(jnp.bfloat16))
        pooled = set_abstraction_mlp(feats_kcf, self.weights, self.biases,
                                     tg=self.tg)                          # (C_out, G)
        new_feats = jnp.transpose(
            pooled.reshape(self.c_out, B, S), (1, 0, 2))                  # (B,C_out,S)
        # match PyTorch return: (new_xyz (B,S,3), features (B, C_out, S))
        return new_xyz, new_feats


if __name__ == "__main__":
    key = jax.random.PRNGKey(0)
    k_xyz, k_pts, k_par = jax.random.split(key, 3)

    B, N, C = 2, 32, 4
    npoint, radius, nsample = 8, 0.4, 16
    mlp_channels = [16, 32]

    xyz = jax.random.uniform(k_xyz, (B, N, 3), dtype=jnp.float32)
    points = jax.random.normal(k_pts, (B, C, N), dtype=jnp.float32)

    sa = PointNetSetAbstractionPallas(npoint, radius, nsample, C, mlp_channels, k_par)
    new_xyz, new_feats = sa(xyz, points)
    (new_xyz, new_feats) = jax.block_until_ready((new_xyz, new_feats))

    assert new_xyz.shape == (B, npoint, 3)
    assert new_feats.shape == (B, mlp_channels[-1], npoint)
    assert bool(jnp.all(jnp.isfinite(new_feats)))
    print("KERNEL_OK")
</pallas_src>

<mosaic_0001>
module attributes {stable_mosaic.version = 11 : i64} {
  func.func @_sa_mlp_kernel(%arg0: i32, %arg1: memref<16x7x128xbf16, #tpu.memory_space<vmem>>, %arg2: memref<16x7xbf16, #tpu.memory_space<vmem>>, %arg3: memref<16x1xf32, #tpu.memory_space<vmem>>, %arg4: memref<32x16xbf16, #tpu.memory_space<vmem>>, %arg5: memref<32x1xf32, #tpu.memory_space<vmem>>, %arg6: memref<32x128xf32, #tpu.memory_space<vmem>>) attributes {dimension_semantics = [#tpu.dimension_semantics<parallel>], iteration_bounds = array<i64: 1>, scalar_prefetch = 0 : i64, scratch_operands = 0 : i64, tpu.core_type = #tpu.core_type<tc>, window_params = [{transform_indices = @transform_0, window_bounds = array<i64: 16, 7, 128>}, {pipeline_mode = #tpu.pipeline_mode<synchronous>, transform_indices = @transform_1, window_bounds = array<i64: 16, 7>}, {pipeline_mode = #tpu.pipeline_mode<synchronous>, transform_indices = @transform_2, window_bounds = array<i64: 16, 1>}, {pipeline_mode = #tpu.pipeline_mode<synchronous>, transform_indices = @transform_3, window_bounds = array<i64: 32, 16>}, {pipeline_mode = #tpu.pipeline_mode<synchronous>, transform_indices = @transform_4, window_bounds = array<i64: 32, 1>}, {transform_indices = @transform_5, window_bounds = array<i64: 32, 128>}]} {
    %c0 = arith.constant 0 : index
    %c0_0 = arith.constant 0 : index
    %0 = vector.load %arg2[%c0, %c0_0] : memref<16x7xbf16, #tpu.memory_space<vmem>>, vector<16x7xbf16>
    %c0_1 = arith.constant 0 : index
    %c0_2 = arith.constant 0 : index
    %1 = vector.load %arg4[%c0_1, %c0_2] : memref<32x16xbf16, #tpu.memory_space<vmem>>, vector<32x16xbf16>
    %c0_3 = arith.constant 0 : index
    %c0_4 = arith.constant 0 : index
    %2 = vector.load %arg3[%c0_3, %c0_4] : memref<16x1xf32, #tpu.memory_space<vmem>>, vector<16x1xf32>
    %c0_5 = arith.constant 0 : index
    %c0_6 = arith.constant 0 : index
    %3 = vector.load %arg5[%c0_5, %c0_6] : memref<32x1xf32, #tpu.memory_space<vmem>>, vector<32x1xf32>
    %c0_7 = arith.constant 0 : index
    %c0_8 = arith.constant 0 : index
    %c0_9 = arith.constant 0 : index
    %4 = vector.load %arg1[%c0_7, %c0_8, %c0_9] : memref<16x7x128xbf16, #tpu.memory_space<vmem>>, vector<1x7x128xbf16>
    %5 = vector.shape_cast %4 : vector<1x7x128xbf16> to vector<7x128xbf16>
    %cst = arith.constant dense<0.000000e+00> : vector<16x128xf32>
    %6 = tpu.matmul %0, %5, %cst {dimension_numbers = #tpu.dot_dimension_numbers<[1], [0], [0], [1], [0, 0, 1, 1], [], []>} : vector<16x7xbf16>, vector<7x128xbf16>, vector<16x128xf32> -> vector<16x128xf32>
    %7 = vector.broadcast %2 : vector<16x1xf32> to vector<16x128xf32>
    %8 = arith.addf %6, %7 : vector<16x128xf32>
    %cst_10 = arith.constant 0.000000e+00 : f32
    %9 = vector.broadcast %cst_10 : f32 to vector<16x128xf32>
    %10 = arith.maximumf %8, %9 : vector<16x128xf32>
    %11 = arith.truncf %10 : vector<16x128xf32> to vector<16x128xbf16>
    %cst_11 = arith.constant dense<0.000000e+00> : vector<32x128xf32>
    %12 = tpu.matmul %1, %11, %cst_11 {dimension_numbers = #tpu.dot_dimension_numbers<[1], [0], [0], [1], [0, 0, 1, 1], [], []>} : vector<32x16xbf16>, vector<16x128xbf16>, vector<32x128xf32> -> vector<32x128xf32>
    %13 = vector.broadcast %3 : vector<32x1xf32> to vector<32x128xf32>
    %14 = arith.addf %12, %13 : vector<32x128xf32>
    %cst_12 = arith.constant 0.000000e+00 : f32
    %15 = vector.broadcast %cst_12 : f32 to vector<32x128xf32>
    %16 = arith.maximumf %14, %15 : vector<32x128xf32>
    %c1 = arith.constant 1 : index
    %c0_13 = arith.constant 0 : index
    %c0_14 = arith.constant 0 : index
    %17 = vector.load %arg1[%c1, %c0_13, %c0_14] : memref<16x7x128xbf16, #tpu.memory_space<vmem>>, vector<1x7x128xbf16>
    %18 = vector.shape_cast %17 : vector<1x7x128xbf16> to vector<7x128xbf16>
    %cst_15 = arith.constant dense<0.000000e+00> : vector<16x128xf32>
    %19 = tpu.matmul %0, %18, %cst_15 {dimension_numbers = #tpu.dot_dimension_numbers<[1], [0], [0], [1], [0, 0, 1, 1], [], []>} : vector<16x7xbf16>, vector<7x128xbf16>, vector<16x128xf32> -> vector<16x128xf32>
    %20 = vector.broadcast %2 : vector<16x1xf32> to vector<16x128xf32>
    %21 = arith.addf %19, %20 : vector<16x128xf32>
    %cst_16 = arith.constant 0.000000e+00 : f32
    %22 = vector.broadcast %cst_16 : f32 to vector<16x128xf32>
    %23 = arith.maximumf %21, %22 : vector<16x128xf32>
    %24 = arith.truncf %23 : vector<16x128xf32> to vector<16x128xbf16>
    %cst_17 = arith.constant dense<0.000000e+00> : vector<32x128xf32>
    %25 = tpu.matmul %1, %24, %cst_17 {dimension_numbers = #tpu.dot_dimension_numbers<[1], [0], [0], [1], [0, 0, 1, 1], [], []>} : vector<32x16xbf16>, vector<16x128xbf16>, vector<32x128xf32> -> vector<32x128xf32>
    %26 = vector.broadcast %3 : vector<32x1xf32> to vector<32x128xf32>
    %27 = arith.addf %25, %26 : vector<32x128xf32>
    %cst_18 = arith.constant 0.000000e+00 : f32
    %28 = vector.broadcast %cst_18 : f32 to vector<32x128xf32>
    %29 = arith.maximumf %27, %28 : vector<32x128xf32>
    %30 = arith.maximumf %16, %29 : vector<32x128xf32>
    %c2 = arith.constant 2 : index
    %c0_19 = arith.constant 0 : index
    %c0_20 = arith.constant 0 : index
    %31 = vector.load %arg1[%c2, %c0_19, %c0_20] : memref<16x7x128xbf16, #tpu.memory_space<vmem>>, vector<1x7x128xbf16>
    %32 = vector.shape_cast %31 : vector<1x7x128xbf16> to vector<7x128xbf16>
    %cst_21 = arith.constant dense<0.000000e+00> : vector<16x128xf32>
    %33 = tpu.matmul %0, %32, %cst_21 {dimension_numbers = #tpu.dot_dimension_numbers<[1], [0], [0], [1], [0, 0, 1, 1], [], []>} : vector<16x7xbf16>, vector<7x128xbf16>, vector<16x128xf32> -> vector<16x128xf32>
    %34 = vector.broadcast %2 : vector<16x1xf32> to vector<16x128xf32>
    %35 = arith.addf %33, %34 : vector<16x128xf32>
    %cst_22 = arith.constant 0.000000e+00 : f32
    %36 = vector.broadcast %cst_22 : f32 to vector<16x128xf32>
    %37 = arith.maximumf %35, %36 : vector<16x128xf32>
    %38 = arith.truncf %37 : vector<16x128xf32> to vector<16x128xbf16>
    %cst_23 = arith.constant dense<0.000000e+00> : vector<32x128xf32>
    %39 = tpu.matmul %1, %38, %cst_23 {dimension_numbers = #tpu.dot_dimension_numbers<[1], [0], [0], [1], [0, 0, 1, 1], [], []>} : vector<32x16xbf16>, vector<16x128xbf16>, vector<32x128xf32> -> vector<32x128xf32>
    %40 = vector.broadcast %3 : vector<32x1xf32> to vector<32x128xf32>
    %41 = arith.addf %39, %40 : vector<32x128xf32>
    %cst_24 = arith.constant 0.000000e+00 : f32
    %42 = vector.broadcast %cst_24 : f32 to vector<32x128xf32>
    %43 = arith.maximumf %41, %42 : vector<32x128xf32>
    %44 = arith.maximumf %30, %43 : vector<32x128xf32>
    %c3 = arith.constant 3 : index
    %c0_25 = arith.constant 0 : index
    %c0_26 = arith.constant 0 : index
    %45 = vector.load %arg1[%c3, %c0_25, %c0_26] : memref<16x7x128xbf16, #tpu.memory_space<vmem>>, vector<1x7x128xbf16>
    %46 = vector.shape_cast %45 : vector<1x7x128xbf16> to vector<7x128xbf16>
    %cst_27 = arith.constant dense<0.000000e+00> : vector<16x128xf32>
    %47 = tpu.matmul %0, %46, %cst_27 {dimension_numbers = #tpu.dot_dimension_numbers<[1], [0], [0], [1], [0, 0, 1, 1], [], []>} : vector<16x7xbf16>, vector<7x128xbf16>, vector<16x128xf32> -> vector<16x128xf32>
    %48 = vector.broadcast %2 : vector<16x1xf32> to vector<16x128xf32>
    %49 = arith.addf %47, %48 : vector<16x128xf32>
    %cst_28 = arith.constant 0.000000e+00 : f32
    %50 = vector.broadcast %cst_28 : f32 to vector<16x128xf32>
    %51 = arith.maximumf %49, %50 : vector<16x128xf32>
    %52 = arith.truncf %51 : vector<16x128xf32> to vector<16x128xbf16>
    %cst_29 = arith.constant dense<0.000000e+00> : vector<32x128xf32>
    %53 = tpu.matmul %1, %52, %cst_29 {dimension_numbers = #tpu.dot_dimension_numbers<[1], [0], [0], [1], [0, 0, 1, 1], [], []>} : vector<32x16xbf16>, vector<16x128xbf16>, vector<32x128xf32> -> vector<32x128xf32>
    %54 = vector.broadcast %3 : vector<32x1xf32> to vector<32x128xf32>
    %55 = arith.addf %53, %54 : vector<32x128xf32>
    %cst_30 = arith.constant 0.000000e+00 : f32
    %56 = vector.broadcast %cst_30 : f32 to vector<32x128xf32>
    %57 = arith.maximumf %55, %56 : vector<32x128xf32>
    %58 = arith.maximumf %44, %57 : vector<32x128xf32>
    %c4 = arith.constant 4 : index
    %c0_31 = arith.constant 0 : index
    %c0_32 = arith.constant 0 : index
    %59 = vector.load %arg1[%c4, %c0_31, %c0_32] : memref<16x7x128xbf16, #tpu.memory_space<vmem>>, vector<1x7x128xbf16>
    %60 = vector.shape_cast %59 : vector<1x7x128xbf16> to vector<7x128xbf16>
    %cst_33 = arith.constant dense<0.000000e+00> : vector<16x128xf32>
    %61 = tpu.matmul %0, %60, %cst_33 {dimension_numbers = #tpu.dot_dimension_numbers<[1], [0], [0], [1], [0, 0, 1, 1], [], []>} : vector<16x7xbf16>, vector<7x128xbf16>, vector<16x128xf32> -> vector<16x128xf32>
    %62 = vector.broadcast %2 : vector<16x1xf32> to vector<16x128xf32>
    %63 = arith.addf %61, %62 : vector<16x128xf32>
    %cst_34 = arith.constant 0.000000e+00 : f32
    %64 = vector.broadcast %cst_34 : f32 to vector<16x128xf32>
    %65 = arith.maximumf %63, %64 : vector<16x128xf32>
    %66 = arith.truncf %65 : vector<16x128xf32> to vector<16x128xbf16>
    %cst_35 = arith.constant dense<0.000000e+00> : vector<32x128xf32>
    %67 = tpu.matmul %1, %66, %cst_35 {dimension_numbers = #tpu.dot_dimension_numbers<[1], [0], [0], [1], [0, 0, 1, 1], [], []>} : vector<32x16xbf16>, vector<16x128xbf16>, vector<32x128xf32> -> vector<32x128xf32>
    %68 = vector.broadcast %3 : vector<32x1xf32> to vector<32x128xf32>
    %69 = arith.addf %67, %68 : vector<32x128xf32>
    %cst_36 = arith.constant 0.000000e+00 : f32
    %70 = vector.broadcast %cst_36 : f32 to vector<32x128xf32>
    %71 = arith.maximumf %69, %70 : vector<32x128xf32>
    %72 = arith.maximumf %58, %71 : vector<32x128xf32>
    %c5 = arith.constant 5 : index
    %c0_37 = arith.constant 0 : index
    %c0_38 = arith.constant 0 : index
    %73 = vector.load %arg1[%c5, %c0_37, %c0_38] : memref<16x7x128xbf16, #tpu.memory_space<vmem>>, vector<1x7x128xbf16>
    %74 = vector.shape_cast %73 : vector<1x7x128xbf16> to vector<7x128xbf16>
    %cst_39 = arith.constant dense<0.000000e+00> : vector<16x128xf32>
    %75 = tpu.matmul %0, %74, %cst_39 {dimension_numbers = #tpu.dot_dimension_numbers<[1], [0], [0], [1], [0, 0, 1, 1], [], []>} : vector<16x7xbf16>, vector<7x128xbf16>, vector<16x128xf32> -> vector<16x128xf32>
    %76 = vector.broadcast %2 : vector<16x1xf32> to vector<16x128xf32>
    %77 = arith.addf %75, %76 : vector<16x128xf32>
    %cst_40 = arith.constant 0.000000e+00 : f32
    %78 = vector.broadcast %cst_40 : f32 to vector<16x128xf32>
    %79 = arith.maximumf %77, %78 : vector<16x128xf32>
    %80 = arith.truncf %79 : vector<16x128xf32> to vector<16x128xbf16>
    %cst_41 = arith.constant dense<0.000000e+00> : vector<32x128xf32>
    %81 = tpu.matmul %1, %80, %cst_41 {dimension_numbers = #tpu.dot_dimension_numbers<[1], [0], [0], [1], [0, 0, 1, 1], [], []>} : vector<32x16xbf16>, vector<16x128xbf16>, vector<32x128xf32> -> vector<32x128xf32>
    %82 = vector.broadcast %3 : vector<32x1xf32> to vector<32x128xf32>
    %83 = arith.addf %81, %82 : vector<32x128xf32>
    %cst_42 = arith.constant 0.000000e+00 : f32
    %84 = vector.broadcast %cst_42 : f32 to vector<32x128xf32>
    %85 = arith.maximumf %83, %84 : vector<32x128xf32>
    %86 = arith.maximumf %72, %85 : vector<32x128xf32>
    %c6 = arith.constant 6 : index
    %c0_43 = arith.constant 0 : index
    %c0_44 = arith.constant 0 : index
    %87 = vector.load %arg1[%c6, %c0_43, %c0_44] : memref<16x7x128xbf16, #tpu.memory_space<vmem>>, vector<1x7x128xbf16>
    %88 = vector.shape_cast %87 : vector<1x7x128xbf16> to vector<7x128xbf16>
    %cst_45 = arith.constant dense<0.000000e+00> : vector<16x128xf32>
    %89 = tpu.matmul %0, %88, %cst_45 {dimension_numbers = #tpu.dot_dimension_numbers<[1], [0], [0], [1], [0, 0, 1, 1], [], []>} : vector<16x7xbf16>, vector<7x128xbf16>, vector<16x128xf32> -> vector<16x128xf32>
    %90 = vector.broadcast %2 : vector<16x1xf32> to vector<16x128xf32>
    %91 = arith.addf %89, %90 : vector<16x128xf32>
    %cst_46 = arith.constant 0.000000e+00 : f32
    %92 = vector.broadcast %cst_46 : f32 to vector<16x128xf32>
    %93 = arith.maximumf %91, %92 : vector<16x128xf32>
    %94 = arith.truncf %93 : vector<16x128xf32> to vector<16x128xbf16>
    %cst_47 = arith.constant dense<0.000000e+00> : vector<32x128xf32>
    %95 = tpu.matmul %1, %94, %cst_47 {dimension_numbers = #tpu.dot_dimension_numbers<[1], [0], [0], [1], [0, 0, 1, 1], [], []>} : vector<32x16xbf16>, vector<16x128xbf16>, vector<32x128xf32> -> vector<32x128xf32>
    %96 = vector.broadcast %3 : vector<32x1xf32> to vector<32x128xf32>
    %97 = arith.addf %95, %96 : vector<32x128xf32>
    %cst_48 = arith.constant 0.000000e+00 : f32
    %98 = vector.broadcast %cst_48 : f32 to vector<32x128xf32>
    %99 = arith.maximumf %97, %98 : vector<32x128xf32>
    %100 = arith.maximumf %86, %99 : vector<32x128xf32>
    %c7 = arith.constant 7 : index
    %c0_49 = arith.constant 0 : index
    %c0_50 = arith.constant 0 : index
    %101 = vector.load %arg1[%c7, %c0_49, %c0_50] : memref<16x7x128xbf16, #tpu.memory_space<vmem>>, vector<1x7x128xbf16>
    %102 = vector.shape_cast %101 : vector<1x7x128xbf16> to vector<7x128xbf16>
    %cst_51 = arith.constant dense<0.000000e+00> : vector<16x128xf32>
    %103 = tpu.matmul %0, %102, %cst_51 {dimension_numbers = #tpu.dot_dimension_numbers<[1], [0], [0], [1], [0, 0, 1, 1], [], []>} : vector<16x7xbf16>, vector<7x128xbf16>, vector<16x128xf32> -> vector<16x128xf32>
    %104 = vector.broadcast %2 : vector<16x1xf32> to vector<16x128xf32>
    %105 = arith.addf %103, %104 : vector<16x128xf32>
    %cst_52 = arith.constant 0.000000e+00 : f32
    %106 = vector.broadcast %cst_52 : f32 to vector<16x128xf32>
    %107 = arith.maximumf %105, %106 : vector<16x128xf32>
    %108 = arith.truncf %107 : vector<16x128xf32> to vector<16x128xbf16>
    %cst_53 = arith.constant dense<0.000000e+00> : vector<32x128xf32>
    %109 = tpu.matmul %1, %108, %cst_53 {dimension_numbers = #tpu.dot_dimension_numbers<[1], [0], [0], [1], [0, 0, 1, 1], [], []>} : vector<32x16xbf16>, vector<16x128xbf16>, vector<32x128xf32> -> vector<32x128xf32>
    %110 = vector.broadcast %3 : vector<32x1xf32> to vector<32x128xf32>
    %111 = arith.addf %109, %110 : vector<32x128xf32>
    %cst_54 = arith.constant 0.000000e+00 : f32
    %112 = vector.broadcast %cst_54 : f32 to vector<32x128xf32>
    %113 = arith.maximumf %111, %112 : vector<32x128xf32>
    %114 = arith.maximumf %100, %113 : vector<32x128xf32>
    %c8 = arith.constant 8 : index
    %c0_55 = arith.constant 0 : index
    %c0_56 = arith.constant 0 : index
    %115 = vector.load %arg1[%c8, %c0_55, %c0_56] : memref<16x7x128xbf16, #tpu.memory_space<vmem>>, vector<1x7x128xbf16>
    %116 = vector.shape_cast %115 : vector<1x7x128xbf16> to vector<7x128xbf16>
    %cst_57 = arith.constant dense<0.000000e+00> : vector<16x128xf32>
    %117 = tpu.matmul %0, %116, %cst_57 {dimension_numbers = #tpu.dot_dimension_numbers<[1], [0], [0], [1], [0, 0, 1, 1], [], []>} : vector<16x7xbf16>, vector<7x128xbf16>, vector<16x128xf32> -> vector<16x128xf32>
    %118 = vector.broadcast %2 : vector<16x1xf32> to vector<16x128xf32>
    %119 = arith.addf %117, %118 : vector<16x128xf32>
    %cst_58 = arith.constant 0.000000e+00 : f32
    %120 = vector.broadcast %cst_58 : f32 to vector<16x128xf32>
    %121 = arith.maximumf %119, %120 : vector<16x128xf32>
    %122 = arith.truncf %121 : vector<16x128xf32> to vector<16x128xbf16>
    %cst_59 = arith.constant dense<0.000000e+00> : vector<32x128xf32>
    %123 = tpu.matmul %1, %122, %cst_59 {dimension_numbers = #tpu.dot_dimension_numbers<[1], [0], [0], [1], [0, 0, 1, 1], [], []>} : vector<32x16xbf16>, vector<16x128xbf16>, vector<32x128xf32> -> vector<32x128xf32>
    %124 = vector.broadcast %3 : vector<32x1xf32> to vector<32x128xf32>
    %125 = arith.addf %123, %124 : vector<32x128xf32>
    %cst_60 = arith.constant 0.000000e+00 : f32
    %126 = vector.broadcast %cst_60 : f32 to vector<32x128xf32>
    %127 = arith.maximumf %125, %126 : vector<32x128xf32>
    %128 = arith.maximumf %114, %127 : vector<32x128xf32>
    %c9 = arith.constant 9 : index
    %c0_61 = arith.constant 0 : index
    %c0_62 = arith.constant 0 : index
    %129 = vector.load %arg1[%c9, %c0_61, %c0_62] : memref<16x7x128xbf16, #tpu.memory_space<vmem>>, vector<1x7x128xbf16>
    %130 = vector.shape_cast %129 : vector<1x7x128xbf16> to vector<7x128xbf16>
    %cst_63 = arith.constant dense<0.000000e+00> : vector<16x128xf32>
    %131 = tpu.matmul %0, %130, %cst_63 {dimension_numbers = #tpu.dot_dimension_numbers<[1], [0], [0], [1], [0, 0, 1, 1], [], []>} : vector<16x7xbf16>, vector<7x128xbf16>, vector<16x128xf32> -> vector<16x128xf32>
    %132 = vector.broadcast %2 : vector<16x1xf32> to vector<16x128xf32>
    %133 = arith.addf %131, %132 : vector<16x128xf32>
    %cst_64 = arith.constant 0.000000e+00 : f32
    %134 = vector.broadcast %cst_64 : f32 to vector<16x128xf32>
    %135 = arith.maximumf %133, %134 : vector<16x128xf32>
    %136 = arith.truncf %135 : vector<16x128xf32> to vector<16x128xbf16>
    %cst_65 = arith.constant dense<0.000000e+00> : vector<32x128xf32>
    %137 = tpu.matmul %1, %136, %cst_65 {dimension_numbers = #tpu.dot_dimension_numbers<[1], [0], [0], [1], [0, 0, 1, 1], [], []>} : vector<32x16xbf16>, vector<16x128xbf16>, vector<32x128xf32> -> vector<32x128xf32>
    %138 = vector.broadcast %3 : vector<32x1xf32> to vector<32x128xf32>
    %139 = arith.addf %137, %138 : vector<32x128xf32>
    %cst_66 = arith.constant 0.000000e+00 : f32
    %140 = vector.broadcast %cst_66 : f32 to vector<32x128xf32>
    %141 = arith.maximumf %139, %140 : vector<32x128xf32>
    %142 = arith.maximumf %128, %141 : vector<32x128xf32>
    %c10 = arith.constant 10 : index
    %c0_67 = arith.constant 0 : index
    %c0_68 = arith.constant 0 : index
    %143 = vector.load %arg1[%c10, %c0_67, %c0_68] : memref<16x7x128xbf16, #tpu.memory_space<vmem>>, vector<1x7x128xbf16>
    %144 = vector.shape_cast %143 : vector<1x7x128xbf16> to vector<7x128xbf16>
    %cst_69 = arith.constant dense<0.000000e+00> : vector<16x128xf32>
    %145 = tpu.matmul %0, %144, %cst_69 {dimension_numbers = #tpu.dot_dimension_numbers<[1], [0], [0], [1], [0, 0, 1, 1], [], []>} : vector<16x7xbf16>, vector<7x128xbf16>, vector<16x128xf32> -> vector<16x128xf32>
    %146 = vector.broadcast %2 : vector<16x1xf32> to vector<16x128xf32>
    %147 = arith.addf %145, %146 : vector<16x128xf32>
    %cst_70 = arith.constant 0.000000e+00 : f32
    %148 = vector.broadcast %cst_70 : f32 to vector<16x128xf32>
    %149 = arith.maximumf %147, %148 : vector<16x128xf32>
    %150 = arith.truncf %149 : vector<16x128xf32> to vector<16x128xbf16>
    %cst_71 = arith.constant dense<0.000000e+00> : vector<32x128xf32>
    %151 = tpu.matmul %1, %150, %cst_71 {dimension_numbers = #tpu.dot_dimension_numbers<[1], [0], [0], [1], [0, 0, 1, 1], [], []>} : vector<32x16xbf16>, vector<16x128xbf16>, vector<32x128xf32> -> vector<32x128xf32>
    %152 = vector.broadcast %3 : vector<32x1xf32> to vector<32x128xf32>
    %153 = arith.addf %151, %152 : vector<32x128xf32>
    %cst_72 = arith.constant 0.000000e+00 : f32
    %154 = vector.broadcast %cst_72 : f32 to vector<32x128xf32>
    %155 = arith.maximumf %153, %154 : vector<32x128xf32>
    %156 = arith.maximumf %142, %155 : vector<32x128xf32>
    %c11 = arith.constant 11 : index
    %c0_73 = arith.constant 0 : index
    %c0_74 = arith.constant 0 : index
    %157 = vector.load %arg1[%c11, %c0_73, %c0_74] : memref<16x7x128xbf16, #tpu.memory_space<vmem>>, vector<1x7x128xbf16>
    %158 = vector.shape_cast %157 : vector<1x7x128xbf16> to vector<7x128xbf16>
    %cst_75 = arith.constant dense<0.000000e+00> : vector<16x128xf32>
    %159 = tpu.matmul %0, %158, %cst_75 {dimension_numbers = #tpu.dot_dimension_numbers<[1], [0], [0], [1], [0, 0, 1, 1], [], []>} : vector<16x7xbf16>, vector<7x128xbf16>, vector<16x128xf32> -> vector<16x128xf32>
    %160 = vector.broadcast %2 : vector<16x1xf32> to vector<16x128xf32>
    %161 = arith.addf %159, %160 : vector<16x128xf32>
    %cst_76 = arith.constant 0.000000e+00 : f32
    %162 = vector.broadcast %cst_76 : f32 to vector<16x128xf32>
    %163 = arith.maximumf %161, %162 : vector<16x128xf32>
    %164 = arith.truncf %163 : vector<16x128xf32> to vector<16x128xbf16>
    %cst_77 = arith.constant dense<0.000000e+00> : vector<32x128xf32>
    %165 = tpu.matmul %1, %164, %cst_77 {dimension_numbers = #tpu.dot_dimension_numbers<[1], [0], [0], [1], [0, 0, 1, 1], [], []>} : vector<32x16xbf16>, vector<16x128xbf16>, vector<32x128xf32> -> vector<32x128xf32>
    %166 = vector.broadcast %3 : vector<32x1xf32> to vector<32x128xf32>
    %167 = arith.addf %165, %166 : vector<32x128xf32>
    %cst_78 = arith.constant 0.000000e+00 : f32
    %168 = vector.broadcast %cst_78 : f32 to vector<32x128xf32>
    %169 = arith.maximumf %167, %168 : vector<32x128xf32>
    %170 = arith.maximumf %156, %169 : vector<32x128xf32>
    %c12 = arith.constant 12 : index
    %c0_79 = arith.constant 0 : index
    %c0_80 = arith.constant 0 : index
    %171 = vector.load %arg1[%c12, %c0_79, %c0_80] : memref<16x7x128xbf16, #tpu.memory_space<vmem>>, vector<1x7x128xbf16>
    %172 = vector.shape_cast %171 : vector<1x7x128xbf16> to vector<7x128xbf16>
    %cst_81 = arith.constant dense<0.000000e+00> : vector<16x128xf32>
    %173 = tpu.matmul %0, %172, %cst_81 {dimension_numbers = #tpu.dot_dimension_numbers<[1], [0], [0], [1], [0, 0, 1, 1], [], []>} : vector<16x7xbf16>, vector<7x128xbf16>, vector<16x128xf32> -> vector<16x128xf32>
    %174 = vector.broadcast %2 : vector<16x1xf32> to vector<16x128xf32>
    %175 = arith.addf %173, %174 : vector<16x128xf32>
    %cst_82 = arith.constant 0.000000e+00 : f32
    %176 = vector.broadcast %cst_82 : f32 to vector<16x128xf32>
    %177 = arith.maximumf %175, %176 : vector<16x128xf32>
    %178 = arith.truncf %177 : vector<16x128xf32> to vector<16x128xbf16>
    %cst_83 = arith.constant dense<0.000000e+00> : vector<32x128xf32>
    %179 = tpu.matmul %1, %178, %cst_83 {dimension_numbers = #tpu.dot_dimension_numbers<[1], [0], [0], [1], [0, 0, 1, 1], [], []>} : vector<32x16xbf16>, vector<16x128xbf16>, vector<32x128xf32> -> vector<32x128xf32>
    %180 = vector.broadcast %3 : vector<32x1xf32> to vector<32x128xf32>
    %181 = arith.addf %179, %180 : vector<32x128xf32>
    %cst_84 = arith.constant 0.000000e+00 : f32
    %182 = vector.broadcast %cst_84 : f32 to vector<32x128xf32>
    %183 = arith.maximumf %181, %182 : vector<32x128xf32>
    %184 = arith.maximumf %170, %183 : vector<32x128xf32>
    %c13 = arith.constant 13 : index
    %c0_85 = arith.constant 0 : index
    %c0_86 = arith.constant 0 : index
    %185 = vector.load %arg1[%c13, %c0_85, %c0_86] : memref<16x7x128xbf16, #tpu.memory_space<vmem>>, vector<1x7x128xbf16>
    %186 = vector.shape_cast %185 : vector<1x7x128xbf16> to vector<7x128xbf16>
    %cst_87 = arith.constant dense<0.000000e+00> : vector<16x128xf32>
    %187 = tpu.matmul %0, %186, %cst_87 {dimension_numbers = #tpu.dot_dimension_numbers<[1], [0], [0], [1], [0, 0, 1, 1], [], []>} : vector<16x7xbf16>, vector<7x128xbf16>, vector<16x128xf32> -> vector<16x128xf32>
    %188 = vector.broadcast %2 : vector<16x1xf32> to vector<16x128xf32>
    %189 = arith.addf %187, %188 : vector<16x128xf32>
    %cst_88 = arith.constant 0.000000e+00 : f32
    %190 = vector.broadcast %cst_88 : f32 to vector<16x128xf32>
    %191 = arith.maximumf %189, %190 : vector<16x128xf32>
    %192 = arith.truncf %191 : vector<16x128xf32> to vector<16x128xbf16>
    %cst_89 = arith.constant dense<0.000000e+00> : vector<32x128xf32>
    %193 = tpu.matmul %1, %192, %cst_89 {dimension_numbers = #tpu.dot_dimension_numbers<[1], [0], [0], [1], [0, 0, 1, 1], [], []>} : vector<32x16xbf16>, vector<16x128xbf16>, vector<32x128xf32> -> vector<32x128xf32>
    %194 = vector.broadcast %3 : vector<32x1xf32> to vector<32x128xf32>
    %195 = arith.addf %193, %194 : vector<32x128xf32>
    %cst_90 = arith.constant 0.000000e+00 : f32
    %196 = vector.broadcast %cst_90 : f32 to vector<32x128xf32>
    %197 = arith.maximumf %195, %196 : vector<32x128xf32>
    %198 = arith.maximumf %184, %197 : vector<32x128xf32>
    %c14 = arith.constant 14 : index
    %c0_91 = arith.constant 0 : index
    %c0_92 = arith.constant 0 : index
    %199 = vector.load %arg1[%c14, %c0_91, %c0_92] : memref<16x7x128xbf16, #tpu.memory_space<vmem>>, vector<1x7x128xbf16>
    %200 = vector.shape_cast %199 : vector<1x7x128xbf16> to vector<7x128xbf16>
    %cst_93 = arith.constant dense<0.000000e+00> : vector<16x128xf32>
    %201 = tpu.matmul %0, %200, %cst_93 {dimension_numbers = #tpu.dot_dimension_numbers<[1], [0], [0], [1], [0, 0, 1, 1], [], []>} : vector<16x7xbf16>, vector<7x128xbf16>, vector<16x128xf32> -> vector<16x128xf32>
    %202 = vector.broadcast %2 : vector<16x1xf32> to vector<16x128xf32>
    %203 = arith.addf %201, %202 : vector<16x128xf32>
    %cst_94 = arith.constant 0.000000e+00 : f32
    %204 = vector.broadcast %cst_94 : f32 to vector<16x128xf32>
    %205 = arith.maximumf %203, %204 : vector<16x128xf32>
    %206 = arith.truncf %205 : vector<16x128xf32> to vector<16x128xbf16>
    %cst_95 = arith.constant dense<0.000000e+00> : vector<32x128xf32>
    %207 = tpu.matmul %1, %206, %cst_95 {dimension_numbers = #tpu.dot_dimension_numbers<[1], [0], [0], [1], [0, 0, 1, 1], [], []>} : vector<32x16xbf16>, vector<16x128xbf16>, vector<32x128xf32> -> vector<32x128xf32>
    %208 = vector.broadcast %3 : vector<32x1xf32> to vector<32x128xf32>
    %209 = arith.addf %207, %208 : vector<32x128xf32>
    %cst_96 = arith.constant 0.000000e+00 : f32
    %210 = vector.broadcast %cst_96 : f32 to vector<32x128xf32>
    %211 = arith.maximumf %209, %210 : vector<32x128xf32>
    %212 = arith.maximumf %198, %211 : vector<32x128xf32>
    %c15 = arith.constant 15 : index
    %c0_97 = arith.constant 0 : index
    %c0_98 = arith.constant 0 : index
    %213 = vector.load %arg1[%c15, %c0_97, %c0_98] : memref<16x7x128xbf16, #tpu.memory_space<vmem>>, vector<1x7x128xbf16>
    %214 = vector.shape_cast %213 : vector<1x7x128xbf16> to vector<7x128xbf16>
    %cst_99 = arith.constant dense<0.000000e+00> : vector<16x128xf32>
    %215 = tpu.matmul %0, %214, %cst_99 {dimension_numbers = #tpu.dot_dimension_numbers<[1], [0], [0], [1], [0, 0, 1, 1], [], []>} : vector<16x7xbf16>, vector<7x128xbf16>, vector<16x128xf32> -> vector<16x128xf32>
    %216 = vector.broadcast %2 : vector<16x1xf32> to vector<16x128xf32>
    %217 = arith.addf %215, %216 : vector<16x128xf32>
    %cst_100 = arith.constant 0.000000e+00 : f32
    %218 = vector.broadcast %cst_100 : f32 to vector<16x128xf32>
    %219 = arith.maximumf %217, %218 : vector<16x128xf32>
    %220 = arith.truncf %219 : vector<16x128xf32> to vector<16x128xbf16>
    %cst_101 = arith.constant dense<0.000000e+00> : vector<32x128xf32>
    %221 = tpu.matmul %1, %220, %cst_101 {dimension_numbers = #tpu.dot_dimension_numbers<[1], [0], [0], [1], [0, 0, 1, 1], [], []>} : vector<32x16xbf16>, vector<16x128xbf16>, vector<32x128xf32> -> vector<32x128xf32>
    %222 = vector.broadcast %3 : vector<32x1xf32> to vector<32x128xf32>
    %223 = arith.addf %221, %222 : vector<32x128xf32>
    %cst_102 = arith.constant 0.000000e+00 : f32
    %224 = vector.broadcast %cst_102 : f32 to vector<32x128xf32>
    %225 = arith.maximumf %223, %224 : vector<32x128xf32>
    %226 = arith.maximumf %212, %225 : vector<32x128xf32>
    %c0_103 = arith.constant 0 : index
    %c0_104 = arith.constant 0 : index
    %227 = vector.load %arg6[%c0_103, %c0_104] : memref<32x128xf32, #tpu.memory_space<vmem>>, vector<32x128xf32>
    tpu.vector_store %arg6[%c0_103, %c0_104], %226 {strides = array<i32>} : memref<32x128xf32, #tpu.memory_space<vmem>>, vector<32x128xf32>,
    return
  }
  func.func @transform_0(%arg0: i32) -> (i32, i32, i32) {
    %c0_i32 = arith.constant 0 : i32
    %c0_i32_0 = arith.constant 0 : i32
    %c0_i32_1 = arith.constant 0 : i32
    return %c0_i32, %c0_i32_0, %arg0 : i32, i32, i32
  }
  func.func @transform_1(%arg0: i32) -> (i32, i32) {
    %c0_i32 = arith.constant 0 : i32
    %c0_i32_0 = arith.constant 0 : i32
    %c0_i32_1 = arith.constant 0 : i32
    return %c0_i32, %c0_i32_0 : i32, i32
  }
  func.func @transform_2(%arg0: i32) -> (i32, i32) {
    %c0_i32 = arith.constant 0 : i32
    %c0_i32_0 = arith.constant 0 : i32
    %c0_i32_1 = arith.constant 0 : i32
    return %c0_i32, %c0_i32_0 : i32, i32
  }
  func.func @transform_3(%arg0: i32) -> (i32, i32) {
    %c0_i32 = arith.constant 0 : i32
    %c0_i32_0 = arith.constant 0 : i32
    %c0_i32_1 = arith.constant 0 : i32
    return %c0_i32, %c0_i32_0 : i32, i32
  }
  func.func @transform_4(%arg0: i32) -> (i32, i32) {
    %c0_i32 = arith.constant 0 : i32
    %c0_i32_0 = arith.constant 0 : i32
    %c0_i32_1 = arith.constant 0 : i32
    return %c0_i32, %c0_i32_0 : i32, i32
  }
  func.func @transform_5(%arg0: i32) -> (i32, i32) {
    %c0_i32 = arith.constant 0 : i32
    %c0_i32_0 = arith.constant 0 : i32
    return %c0_i32, %arg0 : i32, i32
  }
}

</mosaic_0001>

<bundles_post_ra>
// kernel: tpu_custom_call.1
= control target key start
LH: loop header
LB: loop body
LE: loop exit
PB: predicated region body
PF: predicated region fallthrough
CT: control target
= control target key end

     0   :  { %vm54_vm0 = vcmask 1042432   ;;  %vm55_vm1 = vcmask 1043456   ;;  %v2179_v1 = vmov 0.0   ;;  %v2180_v2 = vmov 65535   ;;  %s2579_s0 = inlined_call_operand.vmem [shape: bf16[16,7,128], index: 0, kind: input, shape index: {}]   ;;  %s2580_s1 = inlined_call_operand.vmem [shape: bf16[16,7], index: 1, kind: input, shape index: {}]   ;;  %s2581_s2 = inlined_call_operand.vmem [shape: f32[16,1], index: 2, kind: input, shape index: {}]   ;;  %s2582_s3 = inlined_call_operand.vmem [shape: bf16[32,16], index: 3, kind: input, shape index: {}]   ;;  %s2583_s4 = inlined_call_operand.vmem [shape: f32[32,1], index: 4, kind: input, shape index: {}]   ;;  %s2584_s5 = inlined_call_operand.hbm [shape: f32[32,128], index: 5, kind: output, shape index: {}]  }
   0x1   :  { %v34_v0 = vld [vmem:[%s2579_s0] sm:$0xf]  ;;  %1951 = vmatprep.subr.bf16.mxu0 %v2179_v1  ;;  %v56_v3 = vsel %vm54_vm0, 4294967295, %v2180_v2  ;;  %vm2181_vm2 = vmmov 0   ;;  %v1811_v5 = vld [vmem:[%s2579_s0 + $0x4] sm:$0xf] }
   0x2   :  { %v2220_v4 = vsel %vm55_vm1, %v56_v3, 0  ;;  %1953 = vmatprep.mubr.msk.bf16.mxu0 %vm2181_vm2, %v2179_v1  ;;  %v2182_v7 = vmov 0   ;;  %v2231_v8 = vld [vmem:[%s2580_s1] sm:$0xff]   ;;  %vm50_vm3 = vcmask 56320   ;;  %v29_v11 = vld [vmem:[%s2581_s2 + $0x8] sm:$0xff] }
   0x3   :  { %v59_v6 = vand.u32 %v2220_v4, %v34_v0  ;;  %2150 = vset.pattern.permute.xlu0 %v2182_v7  ;;  %2151 = vset.pattern.permute.xlu1 %v2182_v7  ;;  %v198_v9 = vand.u32 %v1811_v5, %v2220_v4  ;;  %v28_v10 = vld [vmem:[%s2581_s2] sm:$0xff]  ;;  %v1815_v12 = vld [vmem:[%s2579_s0 + $0x8] sm:$0xf] }
   0x4   :  { %37 = vperm.xlu0 %2150, %v28_v10  }
   0x5   :  { %1952 = vmatpush3.bf16.msra.mxu0 %v59_v6 }
   0x6   :  { %1963 = vmatprep.subr.bf16.mxu0 %v2179_v1 }
   0x8   :  { %1954 = vmatmul.mubr.msk.bf16.vlgmr.msra.gmra.mrb[0].mxu0 %vm50_vm3, %v2231_v8 }
   0x9   :  { %1964 = vmatpush3.bf16.msra.mxu0 %v198_v9  ;;  %1965 = vmatprep.mubr.msk.bf16.mxu0 %vm2181_vm2, %v2179_v1 }
   0xa   :  { %1975 = vmatprep.subr.bf16.mxu0 %v2179_v1 }
   0xb   :  { %10 = vsyncpa [#allocation3], 0  ;;  %42 = vperm.xlu0 %2150, %v29_v11   ;;  %v32_v13 = vld [vmem:[%s2583_s4 + $0x10] sm:$0xff]  ;;  %v304_v14 = vand.u32 %v1815_v12, %v2220_v4  ;;  %v1819_v15 = vld [vmem:[%s2579_s0 + $0xc] sm:$0xf]  ;;  %vm135_vm4 = vcmask 130048  }
   0xc   :  { %v410_v16 = vand.u32 %v1819_v15, %v2220_v4  ;;  %v1823_v17 = vld [vmem:[%s2579_s0 + $0x10] sm:$0xf]  ;;  %v1827_v19 = vld [vmem:[%s2579_s0 + $0x14] sm:$0xf]  ;;  %v1831_v21 = vld [vmem:[%s2579_s0 + $0x18] sm:$0xf] }
   0xd   :  { %v516_v18 = vand.u32 %v1823_v17, %v2220_v4  ;;  %v622_v20 = vand.u32 %v1827_v19, %v2220_v4  ;;  %v728_v22 = vand.u32 %v1831_v21, %v2220_v4  ;;  %v1835_v23 = vld [vmem:[%s2579_s0 + $0x1c] sm:$0xf]  ;;  %v1839_v25 = vld [vmem:[%s2579_s0 + $0x20] sm:$0xf]  ;;  %v1843_v27 = vld [vmem:[%s2579_s0 + $0x24] sm:$0xf] }
   0xe   :  { %v834_v24 = vand.u32 %v1835_v23, %v2220_v4  ;;  %v940_v26 = vand.u32 %v1839_v25, %v2220_v4  ;;  %v1046_v28 = vand.u32 %v1843_v27, %v2220_v4  ;;  %v1847_v29 = vld [vmem:[%s2579_s0 + $0x28] sm:$0xf]  ;;  %v1851_v31 = vld [vmem:[%s2579_s0 + $0x2c] sm:$0xf]  ;;  %v1855_v33 = vld [vmem:[%s2579_s0 + $0x30] sm:$0xf] }
   0xf   :  { %117 = vperm.xlu0 %2150, %v32_v13   ;;  %v1152_v30 = vand.u32 %v1847_v29, %v2220_v4  ;;  %v1258_v32 = vand.u32 %v1851_v31, %v2220_v4  ;;  %v1364_v34 = vand.u32 %v1855_v33, %v2220_v4  ;;  %v1859_v35 = vld [vmem:[%s2579_s0 + $0x34] sm:$0xf]  ;;  %v2355_v37 = vld [vmem:[%s2582_s3] sm:$0xff]   ;;  %v1863_v38 = vld [vmem:[%s2579_s0 + $0x38] sm:$0xf] }
  0x10   :  { %1966 = vmatmul.mubr.msk.bf16.vlgmr.msra.gmra.mrb[4].mxu0 %vm50_vm3, %v2231_v8  ;;  %v1470_v36 = vand.u32 %v1859_v35, %v2220_v4  ;;  %1959 = vmatprep.mubr.msk.bf16.mxu1 %vm135_vm4, %v2355_v37  ;;  %v1576_v39 = vand.u32 %v1863_v38, %v2220_v4  ;;  %v1867_v40 = vld [vmem:[%s2579_s0 + $0x3c] sm:$0xf]  ;;  %v30_v42 = vld [vmem:[%s2583_s4] sm:$0xff]  ;;  %v31_v43 = vld [vmem:[%s2583_s4 + $0x8] sm:$0xff] }
  0x11   :  { %1976 = vmatpush3.bf16.msra.mxu0 %v304_v14  ;;  %1977 = vmatprep.mubr.msk.bf16.mxu0 %vm2181_vm2, %v2179_v1  ;;  %v1682_v41 = vand.u32 %v1867_v40, %v2220_v4  ;;  %v33_v44 = vld [vmem:[%s2583_s4 + $0x18] sm:$0xff]  ;;  %v2402_v59 = vld [vmem:[%s2582_s3 + $0x8] sm:$0xff]   ;;  %s2183_s3 = smov [#allocation2]  }
  0x12   :  { %1987 = vmatprep.subr.bf16.mxu0 %v2179_v1  ;;  %107 = vperm.xlu1 %2151, %v30_v42   ;;  %s1794_s12 = sshll.u32 %s2183_s3, 4  ;;  %s1795_s12 = int_to_ptr.vmem [resolvable:$true] %s1794_s12 }
  0x13   :  { %s2155_s13 = scalar_lea.vmem %s1795_s12, 512  ;;  %p2160_p1 = scmp.lt.s32.totalorder %s1795_s12, %s1795_s12 }
  0x14   :  { %p2156_p0 = scmp.ne.s32.totalorder %s1795_s12, %s2155_s13  ;;  %p2161_p2 = scmp.lt.s32.totalorder %s2155_s13, %s2155_s13 }
  0x16   :  { %112 = vperm.xlu1 %2151, %v31_v43   ;;  %p2162_p3 = por %p2161_p2, %p2160_p1 }
  0x18   :  { %1978 = vmatmul.mubr.msk.bf16.vlgmr.msra.gmra.mrb[8].mxu0 %vm50_vm3, %v2231_v8  ;;  %p2163_p4 = pnand %p2162_p3, %p2156_p0 }
  0x19   :  { %1988 = vmatpush3.bf16.msra.mxu0 %v410_v16  ;;  %1989 = vmatprep.mubr.msk.bf16.mxu0 %vm2181_vm2, %v2179_v1 }
  0x1a   :  { %1999 = vmatprep.subr.bf16.mxu0 %v2179_v1  ;;  %122 = vperm.xlu1 %2151, %v33_v44  }
  0x20   :  { %1990 = vmatmul.mubr.msk.bf16.vlgmr.msra.gmra.mrb[12].mxu0 %vm50_vm3, %v2231_v8 }
  0x21   :  { %2000 = vmatpush3.bf16.msra.mxu0 %v516_v18  ;;  %2001 = vmatprep.mubr.msk.bf16.mxu0 %vm2181_vm2, %v2179_v1 }
  0x22   :  { %2011 = vmatprep.subr.bf16.mxu0 %v2179_v1 }
  0x28   :  { %2002 = vmatmul.mubr.msk.bf16.vlgmr.msra.gmra.mrb[16].mxu0 %vm50_vm3, %v2231_v8 }
  0x29   :  { %2012 = vmatpush3.bf16.msra.mxu0 %v622_v20  ;;  %2013 = vmatprep.mubr.msk.bf16.mxu0 %vm2181_vm2, %v2179_v1 }
  0x2a   :  { %2023 = vmatprep.subr.bf16.mxu0 %v2179_v1 }
  0x30   :  { %2014 = vmatmul.mubr.msk.bf16.vlgmr.msra.gmra.mrb[20].mxu0 %vm50_vm3, %v2231_v8 }
  0x31   :  { %2024 = vmatpush3.bf16.msra.mxu0 %v728_v22  ;;  %2025 = vmatprep.mubr.msk.bf16.mxu0 %vm2181_vm2, %v2179_v1 }
  0x32   :  { %2035 = vmatprep.subr.bf16.mxu0 %v2179_v1 }
  0x38   :  { %2026 = vmatmul.mubr.msk.bf16.vlgmr.msra.gmra.mrb[24].mxu0 %vm50_vm3, %v2231_v8 }
  0x39   :  { %2036 = vmatpush3.bf16.msra.mxu0 %v834_v24  ;;  %2037 = vmatprep.mubr.msk.bf16.mxu0 %vm2181_vm2, %v2179_v1 }
  0x3a   :  { %2047 = vmatprep.subr.bf16.mxu0 %v2179_v1 }
  0x40   :  { %2038 = vmatmul.mubr.msk.bf16.vlgmr.msra.gmra.mrb[28].mxu0 %vm50_vm3, %v2231_v8 }
  0x41   :  { %2048 = vmatpush3.bf16.msra.mxu0 %v940_v26  ;;  %2049 = vmatprep.mubr.msk.bf16.mxu0 %vm2181_vm2, %v2179_v1 }
  0x42   :  { %2059 = vmatprep.subr.bf16.mxu0 %v2179_v1 }
  0x48   :  { %2050 = vmatmul.mubr.msk.bf16.vlgmr.msra.gmra.mrb[32].mxu0 %vm50_vm3, %v2231_v8 }
  0x49   :  { %2060 = vmatpush3.bf16.msra.mxu0 %v1046_v28  ;;  %2061 = vmatprep.mubr.msk.bf16.mxu0 %vm2181_vm2, %v2179_v1 }
  0x4a   :  { %2071 = vmatprep.subr.bf16.mxu0 %v2179_v1 }
  0x50   :  { %2062 = vmatmul.mubr.msk.bf16.vlgmr.msra.gmra.mrb[36].mxu0 %vm50_vm3, %v2231_v8 }
  0x51   :  { %2072 = vmatpush3.bf16.msra.mxu0 %v1152_v30  ;;  %2073 = vmatprep.mubr.msk.bf16.mxu0 %vm2181_vm2, %v2179_v1 }
  0x52   :  { %2083 = vmatprep.subr.bf16.mxu0 %v2179_v1 }
  0x58   :  { %2074 = vmatmul.mubr.msk.bf16.vlgmr.msra.gmra.mrb[40].mxu0 %vm50_vm3, %v2231_v8 }
  0x59   :  { %2084 = vmatpush3.bf16.msra.mxu0 %v1258_v32  ;;  %2085 = vmatprep.mubr.msk.bf16.mxu0 %vm2181_vm2, %v2179_v1 }
  0x5a   :  { %2095 = vmatprep.subr.bf16.mxu0 %v2179_v1 }
  0x60   :  { %2086 = vmatmul.mubr.msk.bf16.vlgmr.msra.gmra.mrb[44].mxu0 %vm50_vm3, %v2231_v8 }
  0x61   :  { %2096 = vmatpush3.bf16.msra.mxu0 %v1364_v34  ;;  %2097 = vmatprep.mubr.msk.bf16.mxu0 %vm2181_vm2, %v2179_v1 }
  0x62   :  { %2107 = vmatprep.subr.bf16.mxu0 %v2179_v1 }
  0x68   :  { %2098 = vmatmul.mubr.msk.bf16.vlgmr.msra.gmra.mrb[48].mxu0 %vm50_vm3, %v2231_v8 }
  0x69   :  { %2108 = vmatpush3.bf16.msra.mxu0 %v1470_v36  ;;  %2109 = vmatprep.mubr.msk.bf16.mxu0 %vm2181_vm2, %v2179_v1 }
  0x6a   :  { %2119 = vmatprep.subr.bf16.mxu0 %v2179_v1 }
  0x70   :  { %2110 = vmatmul.mubr.msk.bf16.vlgmr.msra.gmra.mrb[52].mxu0 %vm50_vm3, %v2231_v8 }
  0x71   :  { %2120 = vmatpush3.bf16.msra.mxu0 %v1576_v39  ;;  %2121 = vmatprep.mubr.msk.bf16.mxu0 %vm2181_vm2, %v2179_v1 }
  0x72   :  { %2131 = vmatprep.subr.bf16.mxu0 %v2179_v1 }
  0x78   :  { %2122 = vmatmul.mubr.msk.bf16.vlgmr.msra.gmra.mrb[56].mxu0 %vm50_vm3, %v2231_v8 }
  0x79   :  { %2132 = vmatpush3.bf16.msra.mxu0 %v1682_v41  ;;  %2133 = vmatprep.mubr.msk.bf16.mxu0 %vm2181_vm2, %v2179_v1 }
  0x80   :  { %2134 = vmatmul.mubr.msk.bf16.vlgmr.msra.gmra.mrb[60].mxu0 %vm50_vm3, %v2231_v8 }
  0x83   :  { %v2392_v45 = vpop.permute.xlu0 %37 }
  0x8a   :  { %v2395_v49 = vpop.permute.xlu0 %42 }
  0xdb   :  { %v95_v46 = vpop.f32.mrb[0].mxu0 }
  0xdc   :  { %v96_v47 = vadd.f32 %v95_v46, %v2392_v45  ;;  %v1955_v48 = vpop.f32.mrb[1].mxu0 }
  0xdd   :  { %v98_v50 = vpop.f32.mrb[2].mxu0 }
  0xde   :  { %v99_v51 = vadd.f32 %v98_v50, %v2395_v49  ;;  %v1956_v52 = vpop.f32.mrb[3].mxu0  ;;  %v102_v53 = vmax.f32 %v96_v47, 0.0 }
  0xe0   :  { %v103_v54 = vmax.f32 %v99_v51, 0.0 }
  0xe2   :  { %v104_v55 = vpack.c.bf16 %v103_v54, %v102_v53 }
  0xe3   :  { %v234_v56 = vpop.f32.mrb[4].mxu0 }
  0xe4   :  { %v235_v57 = vadd.f32 %v234_v56, %v2392_v45  ;;  %1957 = vmatprep.subr.bf16.mxu1 %v104_v55  ;;  %v1967_v58 = vpop.f32.mrb[5].mxu0 }
  0xe5   :  { %1958 = vmatpush3.bf16.msra.mxu1 %v104_v55  ;;  %v237_v60 = vpop.f32.mrb[6].mxu0 }
  0xe6   :  { %v238_v61 = vadd.f32 %v237_v60, %v2395_v49  ;;  %v1968_v62 = vpop.f32.mrb[7].mxu0  ;;  %v241_v63 = vmax.f32 %v235_v57, 0.0 }
  0xe8   :  { %v242_v0 = vmax.f32 %v238_v61, 0.0  ;;  %1960 = vmatmul.mubr.msk.bf16.vlgmr.msra.gmra.mrb[0].mxu1 %vm135_vm4, %v2402_v59 }
  0xe9   :  { %1971 = vmatprep.mubr.msk.bf16.mxu1 %vm135_vm4, %v2355_v37 }
  0xea   :  { %v243_v1 = vpack.c.bf16 %v242_v0, %v241_v63 }
  0xeb   :  { %v340_v2 = vpop.f32.mrb[8].mxu0 }
  0xec   :  { %v341_v3 = vadd.f32 %v340_v2, %v2392_v45  ;;  %1969 = vmatprep.subr.bf16.mxu1 %v243_v1  ;;  %v1979_v4 = vpop.f32.mrb[9].mxu0 }
  0xed   :  { %1970 = vmatpush3.bf16.msra.mxu1 %v243_v1  ;;  %v343_v5 = vpop.f32.mrb[10].mxu0 }
  0xee   :  { %v344_v6 = vadd.f32 %v343_v5, %v2395_v49  ;;  %v1980_v7 = vpop.f32.mrb[11].mxu0  ;;  %v347_v8 = vmax.f32 %v341_v3, 0.0 }
  0xf0   :  { %v348_v9 = vmax.f32 %v344_v6, 0.0  ;;  %1972 = vmatmul.mubr.msk.bf16.vlgmr.msra.gmra.mrb[4].mxu1 %vm135_vm4, %v2402_v59 }
  0xf1   :  { %1983 = vmatprep.mubr.msk.bf16.mxu1 %vm135_vm4, %v2355_v37 }
  0xf2   :  { %v349_v10 = vpack.c.bf16 %v348_v9, %v347_v8 }
  0xf3   :  { %v446_v11 = vpop.f32.mrb[12].mxu0 }
  0xf4   :  { %v447_v12 = vadd.f32 %v446_v11, %v2392_v45  ;;  %1981 = vmatprep.subr.bf16.mxu1 %v349_v10  ;;  %v1991_v13 = vpop.f32.mrb[13].mxu0 }
  0xf5   :  { %1982 = vmatpush3.bf16.msra.mxu1 %v349_v10  ;;  %v449_v14 = vpop.f32.mrb[14].mxu0 }
  0xf6   :  { %v450_v15 = vadd.f32 %v449_v14, %v2395_v49  ;;  %v1992_v16 = vpop.f32.mrb[15].mxu0  ;;  %v453_v17 = vmax.f32 %v447_v12, 0.0 }
  0xf8   :  { %v454_v18 = vmax.f32 %v450_v15, 0.0  ;;  %1984 = vmatmul.mubr.msk.bf16.vlgmr.msra.gmra.mrb[8].mxu1 %vm135_vm4, %v2402_v59 }
  0xf9   :  { %1995 = vmatprep.mubr.msk.bf16.mxu1 %vm135_vm4, %v2355_v37 }
  0xfa   :  { %v455_v19 = vpack.c.bf16 %v454_v18, %v453_v17 }
  0xfb   :  { %v552_v20 = vpop.f32.mrb[16].mxu0 }
  0xfc   :  { %v553_v21 = vadd.f32 %v552_v20, %v2392_v45  ;;  %1993 = vmatprep.subr.bf16.mxu1 %v455_v19  ;;  %v2003_v22 = vpop.f32.mrb[17].mxu0 }
  0xfd   :  { %1994 = vmatpush3.bf16.msra.mxu1 %v455_v19  ;;  %v555_v23 = vpop.f32.mrb[18].mxu0 }
  0xfe   :  { %v556_v24 = vadd.f32 %v555_v23, %v2395_v49  ;;  %v2004_v25 = vpop.f32.mrb[19].mxu0  ;;  %v559_v26 = vmax.f32 %v553_v21, 0.0 }
 0x100   :  { %v560_v27 = vmax.f32 %v556_v24, 0.0  ;;  %1996 = vmatmul.mubr.msk.bf16.vlgmr.msra.gmra.mrb[12].mxu1 %vm135_vm4, %v2402_v59 }
 0x101   :  { %2007 = vmatprep.mubr.msk.bf16.mxu1 %vm135_vm4, %v2355_v37 }
 0x102   :  { %v561_v28 = vpack.c.bf16 %v560_v27, %v559_v26 }
 0x103   :  { %v658_v29 = vpop.f32.mrb[20].mxu0 }
 0x104   :  { %v659_v30 = vadd.f32 %v658_v29, %v2392_v45  ;;  %2005 = vmatprep.subr.bf16.mxu1 %v561_v28  ;;  %v2015_v31 = vpop.f32.mrb[21].mxu0 }
 0x105   :  { %2006 = vmatpush3.bf16.msra.mxu1 %v561_v28  ;;  %v661_v32 = vpop.f32.mrb[22].mxu0 }
 0x106   :  { %v662_v33 = vadd.f32 %v661_v32, %v2395_v49  ;;  %v2016_v34 = vpop.f32.mrb[23].mxu0  ;;  %v665_v35 = vmax.f32 %v659_v30, 0.0 }
 0x108   :  { %v666_v36 = vmax.f32 %v662_v33, 0.0  ;;  %2008 = vmatmul.mubr.msk.bf16.vlgmr.msra.gmra.mrb[16].mxu1 %vm135_vm4, %v2402_v59 }
 0x109   :  { %2019 = vmatprep.mubr.msk.bf16.mxu1 %vm135_vm4, %v2355_v37 }
 0x10a   :  { %v667_v38 = vpack.c.bf16 %v666_v36, %v665_v35 }
 0x10b   :  { %v764_v39 = vpop.f32.mrb[24].mxu0 }
 0x10c   :  { %v765_v40 = vadd.f32 %v764_v39, %v2392_v45  ;;  %2017 = vmatprep.subr.bf16.mxu1 %v667_v38  ;;  %v2027_v41 = vpop.f32.mrb[25].mxu0 }
 0x10d   :  { %2018 = vmatpush3.bf16.msra.mxu1 %v667_v38  ;;  %v767_v42 = vpop.f32.mrb[26].mxu0 }
 0x10e   :  { %v768_v43 = vadd.f32 %v767_v42, %v2395_v49  ;;  %v2028_v44 = vpop.f32.mrb[27].mxu0  ;;  %v771_v46 = vmax.f32 %v765_v40, 0.0 }
 0x110   :  { %v772_v47 = vmax.f32 %v768_v43, 0.0  ;;  %2020 = vmatmul.mubr.msk.bf16.vlgmr.msra.gmra.mrb[20].mxu1 %vm135_vm4, %v2402_v59 }
 0x111   :  { %2031 = vmatprep.mubr.msk.bf16.mxu1 %vm135_vm4, %v2355_v37 }
 0x112   :  { %v773_v48 = vpack.c.bf16 %v772_v47, %v771_v46 }
 0x113   :  { %v870_v50 = vpop.f32.mrb[28].mxu0 }
 0x114   :  { %v871_v51 = vadd.f32 %v870_v50, %v2392_v45  ;;  %2029 = vmatprep.subr.bf16.mxu1 %v773_v48  ;;  %v2039_v52 = vpop.f32.mrb[29].mxu0 }
 0x115   :  { %2030 = vmatpush3.bf16.msra.mxu1 %v773_v48  ;;  %v873_v53 = vpop.f32.mrb[30].mxu0 }
 0x116   :  { %v874_v54 = vadd.f32 %v873_v53, %v2395_v49  ;;  %v2040_v55 = vpop.f32.mrb[31].mxu0  ;;  %v877_v56 = vmax.f32 %v871_v51, 0.0 }
 0x118   :  { %v878_v57 = vmax.f32 %v874_v54, 0.0  ;;  %2032 = vmatmul.mubr.msk.bf16.vlgmr.msra.gmra.mrb[24].mxu1 %vm135_vm4, %v2402_v59 }
 0x119   :  { %2043 = vmatprep.mubr.msk.bf16.mxu1 %vm135_vm4, %v2355_v37 }
 0x11a   :  { %v879_v58 = vpack.c.bf16 %v878_v57, %v877_v56 }
 0x11b   :  { %v976_v60 = vpop.f32.mrb[32].mxu0 }
 0x11c   :  { %v977_v61 = vadd.f32 %v976_v60, %v2392_v45  ;;  %2041 = vmatprep.subr.bf16.mxu1 %v879_v58  ;;  %v2051_v62 = vpop.f32.mrb[33].mxu0 }
 0x11d   :  { %2042 = vmatpush3.bf16.msra.mxu1 %v879_v58  ;;  %v979_v63 = vpop.f32.mrb[34].mxu0 }
 0x11e   :  { %v980_v0 = vadd.f32 %v979_v63, %v2395_v49  ;;  %v2052_v1 = vpop.f32.mrb[35].mxu0  ;;  %v983_v2 = vmax.f32 %v977_v61, 0.0 }
 0x120   :  { %v984_v3 = vmax.f32 %v980_v0, 0.0  ;;  %2044 = vmatmul.mubr.msk.bf16.vlgmr.msra.gmra.mrb[28].mxu1 %vm135_vm4, %v2402_v59 }
 0x121   :  { %2055 = vmatprep.mubr.msk.bf16.mxu1 %vm135_vm4, %v2355_v37 }
 0x122   :  { %v985_v4 = vpack.c.bf16 %v984_v3, %v983_v2 }
 0x123   :  { %v1082_v5 = vpop.f32.mrb[36].mxu0 }
 0x124   :  { %v1083_v6 = vadd.f32 %v1082_v5, %v2392_v45  ;;  %2053 = vmatprep.subr.bf16.mxu1 %v985_v4  ;;  %v2063_v7 = vpop.f32.mrb[37].mxu0 }
 0x125   :  { %2054 = vmatpush3.bf16.msra.mxu1 %v985_v4  ;;  %v1085_v8 = vpop.f32.mrb[38].mxu0 }
 0x126   :  { %v1086_v9 = vadd.f32 %v1085_v8, %v2395_v49  ;;  %v2064_v10 = vpop.f32.mrb[39].mxu0  ;;  %v1089_v11 = vmax.f32 %v1083_v6, 0.0 }
 0x128   :  { %v1090_v12 = vmax.f32 %v1086_v9, 0.0  ;;  %2056 = vmatmul.mubr.msk.bf16.vlgmr.msra.gmra.mrb[32].mxu1 %vm135_vm4, %v2402_v59 }
 0x129   :  { %2067 = vmatprep.mubr.msk.bf16.mxu1 %vm135_vm4, %v2355_v37 }
 0x12a   :  { %v1091_v13 = vpack.c.bf16 %v1090_v12, %v1089_v11  ;;  %v2499_v12 = vpop.permute.xlu0 %117 }
 0x12b   :  { %v1188_v14 = vpop.f32.mrb[40].mxu0 }
 0x12c   :  { %v1189_v15 = vadd.f32 %v1188_v14, %v2392_v45  ;;  %2065 = vmatprep.subr.bf16.mxu1 %v1091_v13  ;;  %v2075_v16 = vpop.f32.mrb[41].mxu0 }
 0x12d   :  { %2066 = vmatpush3.bf16.msra.mxu1 %v1091_v13  ;;  %v1191_v17 = vpop.f32.mrb[42].mxu0 }
 0x12e   :  { %v1192_v18 = vadd.f32 %v1191_v17, %v2395_v49  ;;  %v2076_v19 = vpop.f32.mrb[43].mxu0  ;;  %v1195_v20 = vmax.f32 %v1189_v15, 0.0 }
 0x130   :  { %v1196_v21 = vmax.f32 %v1192_v18, 0.0  ;;  %2068 = vmatmul.mubr.msk.bf16.vlgmr.msra.gmra.mrb[36].mxu1 %vm135_vm4, %v2402_v59 }
 0x131   :  { %2079 = vmatprep.mubr.msk.bf16.mxu1 %vm135_vm4, %v2355_v37 }
 0x132   :  { %v1197_v22 = vpack.c.bf16 %v1196_v21, %v1195_v20 }
 0x133   :  { %v1294_v23 = vpop.f32.mrb[44].mxu0 }
 0x134   :  { %v1295_v24 = vadd.f32 %v1294_v23, %v2392_v45  ;;  %2077 = vmatprep.subr.bf16.mxu1 %v1197_v22  ;;  %v2087_v25 = vpop.f32.mrb[45].mxu0 }
 0x135   :  { %2078 = vmatpush3.bf16.msra.mxu1 %v1197_v22  ;;  %v1297_v26 = vpop.f32.mrb[46].mxu0 }
 0x136   :  { %v1298_v27 = vadd.f32 %v1297_v26, %v2395_v49  ;;  %v2088_v28 = vpop.f32.mrb[47].mxu0  ;;  %v1301_v29 = vmax.f32 %v1295_v24, 0.0 }
 0x138   :  { %v1302_v30 = vmax.f32 %v1298_v27, 0.0  ;;  %2080 = vmatmul.mubr.msk.bf16.vlgmr.msra.gmra.mrb[40].mxu1 %vm135_vm4, %v2402_v59 }
 0x139   :  { %2091 = vmatprep.mubr.msk.bf16.mxu1 %vm135_vm4, %v2355_v37 }
 0x13a   :  { %v1303_v31 = vpack.c.bf16 %v1302_v30, %v1301_v29 }
 0x13b   :  { %v1400_v32 = vpop.f32.mrb[48].mxu0 }
 0x13c   :  { %v1401_v33 = vadd.f32 %v1400_v32, %v2392_v45  ;;  %2089 = vmatprep.subr.bf16.mxu1 %v1303_v31  ;;  %v2099_v34 = vpop.f32.mrb[49].mxu0 }
 0x13d   :  { %2090 = vmatpush3.bf16.msra.mxu1 %v1303_v31  ;;  %v1403_v35 = vpop.f32.mrb[50].mxu0 }
 0x13e   :  { %v1404_v36 = vadd.f32 %v1403_v35, %v2395_v49  ;;  %v2100_v38 = vpop.f32.mrb[51].mxu0  ;;  %v1407_v39 = vmax.f32 %v1401_v33, 0.0 }
 0x140   :  { %v1408_v40 = vmax.f32 %v1404_v36, 0.0  ;;  %2092 = vmatmul.mubr.msk.bf16.vlgmr.msra.gmra.mrb[44].mxu1 %vm135_vm4, %v2402_v59 }
 0x141   :  { %2103 = vmatprep.mubr.msk.bf16.mxu1 %vm135_vm4, %v2355_v37 }
 0x142   :  { %v1409_v41 = vpack.c.bf16 %v1408_v40, %v1407_v39 }
 0x143   :  { %v1506_v42 = vpop.f32.mrb[52].mxu0 }
 0x144   :  { %v1507_v43 = vadd.f32 %v1506_v42, %v2392_v45  ;;  %2101 = vmatprep.subr.bf16.mxu1 %v1409_v41  ;;  %v2111_v44 = vpop.f32.mrb[53].mxu0 }
 0x145   :  { %2102 = vmatpush3.bf16.msra.mxu1 %v1409_v41  ;;  %v1509_v46 = vpop.f32.mrb[54].mxu0 }
 0x146   :  { %v1510_v47 = vadd.f32 %v1509_v46, %v2395_v49  ;;  %v2112_v48 = vpop.f32.mrb[55].mxu0  ;;  %v1513_v50 = vmax.f32 %v1507_v43, 0.0 }
 0x148   :  { %v1514_v51 = vmax.f32 %v1510_v47, 0.0  ;;  %2104 = vmatmul.mubr.msk.bf16.vlgmr.msra.gmra.mrb[48].mxu1 %vm135_vm4, %v2402_v59 }
 0x149   :  { %2115 = vmatprep.mubr.msk.bf16.mxu1 %vm135_vm4, %v2355_v37 }
 0x14a   :  { %v1515_v52 = vpack.c.bf16 %v1514_v51, %v1513_v50 }
 0x14b   :  { %v1612_v53 = vpop.f32.mrb[56].mxu0 }
 0x14c   :  { %v1613_v54 = vadd.f32 %v1612_v53, %v2392_v45  ;;  %2113 = vmatprep.subr.bf16.mxu1 %v1515_v52  ;;  %v2123_v55 = vpop.f32.mrb[57].mxu0 }
 0x14d   :  { %2114 = vmatpush3.bf16.msra.mxu1 %v1515_v52  ;;  %v1615_v56 = vpop.f32.mrb[58].mxu0 }
 0x14e   :  { %v1616_v57 = vadd.f32 %v1615_v56, %v2395_v49  ;;  %v2124_v58 = vpop.f32.mrb[59].mxu0  ;;  %v1619_v60 = vmax.f32 %v1613_v54, 0.0 }
 0x150   :  { %v1620_v61 = vmax.f32 %v1616_v57, 0.0  ;;  %2116 = vmatmul.mubr.msk.bf16.vlgmr.msra.gmra.mrb[52].mxu1 %vm135_vm4, %v2402_v59 }
 0x151   :  { %2127 = vmatprep.mubr.msk.bf16.mxu1 %vm135_vm4, %v2355_v37 }
 0x152   :  { %v1621_v62 = vpack.c.bf16 %v1620_v61, %v1619_v60 }
 0x153   :  { %v1718_v63 = vpop.f32.mrb[60].mxu0 }
 0x154   :  { %v1719_v0 = vadd.f32 %v1718_v63, %v2392_v45  ;;  %2125 = vmatprep.subr.bf16.mxu1 %v1621_v62  ;;  %v2135_v1 = vpop.f32.mrb[61].mxu0  ;;  %v2495_v45 = vpop.permute.xlu1 %107 }
 0x155   :  { %2126 = vmatpush3.bf16.msra.mxu1 %v1621_v62  ;;  %v1721_v2 = vpop.f32.mrb[62].mxu0 }
 0x156   :  { %v1722_v3 = vadd.f32 %v1721_v2, %v2395_v49  ;;  %v2136_v4 = vpop.f32.mrb[63].mxu0  ;;  %v1725_v5 = vmax.f32 %v1719_v0, 0.0 }
 0x158   :  { %v1726_v6 = vmax.f32 %v1722_v3, 0.0  ;;  %2128 = vmatmul.mubr.msk.bf16.vlgmr.msra.gmra.mrb[56].mxu1 %vm135_vm4, %v2402_v59  ;;  %v2497_v9 = vpop.permute.xlu1 %112 }
 0x159   :  { %2139 = vmatprep.mubr.msk.bf16.mxu1 %vm135_vm4, %v2355_v37 }
 0x15a   :  { %v1727_v7 = vpack.c.bf16 %v1726_v6, %v1725_v5 }
 0x15c   :  { %2137 = vmatprep.subr.bf16.mxu1 %v1727_v7  ;;  %v2501_v13 = vpop.permute.xlu1 %122 }
 0x15d   :  { %2138 = vmatpush3.bf16.msra.mxu1 %v1727_v7 }
 0x160   :  { %2140 = vmatmul.mubr.msk.bf16.vlgmr.msra.gmra.mrb[60].mxu1 %vm135_vm4, %v2402_v59 }
 0x1bb   :  { %v1961_v8 = vpop.f32.mrb[0].mxu1 }
 0x1bc   :  { %v176_v49 = vpop.f32.mrb[1].mxu1  ;;  %v185_v37 = vadd.f32 %v1961_v8, %v2499_v12 }
 0x1bd   :  { %v1962_v10 = vpop.f32.mrb[2].mxu1  ;;  %v177_v14 = vadd.f32 %v176_v49, %v2495_v45 }
 0x1be   :  { %v179_v11 = vpop.f32.mrb[3].mxu1  ;;  %v188_v17 = vadd.f32 %v1962_v10, %v2501_v13  ;;  %v193_v21 = vmax.f32 %v185_v37, 0.0 }
 0x1bf   :  { %v180_v18 = vadd.f32 %v179_v11, %v2497_v9  ;;  %v191_v25 = vmax.f32 %v177_v14, 0.0 }
 0x1c0   :  { %v194_v29 = vmax.f32 %v188_v17, 0.0 }
 0x1c1   :  { %v192_v31 = vmax.f32 %v180_v18, 0.0 }
 0x1c3   :  { %v1973_v15 = vpop.f32.mrb[4].mxu1 }
 0x1c4   :  { %v287_v16 = vadd.f32 %v1973_v15, %v2499_v12  ;;  %v278_v59 = vpop.f32.mrb[5].mxu1 }
 0x1c5   :  { %v279_v19 = vadd.f32 %v278_v59, %v2495_v45  ;;  %v1974_v20 = vpop.f32.mrb[6].mxu1 }
 0x1c6   :  { %v295_v22 = vmax.f32 %v287_v16, 0.0  ;;  %v290_v23 = vadd.f32 %v1974_v20, %v2501_v13  ;;  %v281_v24 = vpop.f32.mrb[7].mxu1 }
 0x1c7   :  { %v293_v26 = vmax.f32 %v279_v19, 0.0  ;;  %v282_v27 = vadd.f32 %v281_v24, %v2497_v9 }
 0x1c8   :  { %v299_v28 = vmax.f32 %v193_v21, %v295_v22  ;;  %v296_v30 = vmax.f32 %v290_v23, 0.0 }
 0x1c9   :  { %v297_v32 = vmax.f32 %v191_v25, %v293_v26  ;;  %v294_v33 = vmax.f32 %v282_v27, 0.0 }
 0x1ca   :  { %v300_v34 = vmax.f32 %v194_v29, %v296_v30 }
 0x1cb   :  { %v298_v35 = vmax.f32 %v192_v31, %v294_v33  ;;  %v1985_v36 = vpop.f32.mrb[8].mxu1 }
 0x1cc   :  { %v393_v38 = vadd.f32 %v1985_v36, %v2499_v12  ;;  %v384_v39 = vpop.f32.mrb[9].mxu1 }
 0x1cd   :  { %v385_v40 = vadd.f32 %v384_v39, %v2495_v45  ;;  %v1986_v41 = vpop.f32.mrb[10].mxu1 }
 0x1ce   :  { %v401_v42 = vmax.f32 %v393_v38, 0.0  ;;  %v396_v43 = vadd.f32 %v1986_v41, %v2501_v13  ;;  %v387_v44 = vpop.f32.mrb[11].mxu1 }
 0x1cf   :  { %v399_v46 = vmax.f32 %v385_v40, 0.0  ;;  %v388_v47 = vadd.f32 %v387_v44, %v2497_v9 }
 0x1d0   :  { %v405_v48 = vmax.f32 %v299_v28, %v401_v42  ;;  %v402_v50 = vmax.f32 %v396_v43, 0.0 }
 0x1d1   :  { %v403_v51 = vmax.f32 %v297_v32, %v399_v46  ;;  %v400_v52 = vmax.f32 %v388_v47, 0.0 }
 0x1d2   :  { %v406_v53 = vmax.f32 %v300_v34, %v402_v50 }
 0x1d3   :  { %v404_v54 = vmax.f32 %v298_v35, %v400_v52  ;;  %v1997_v55 = vpop.f32.mrb[12].mxu1 }
 0x1d4   :  { %v499_v56 = vadd.f32 %v1997_v55, %v2499_v12  ;;  %v490_v57 = vpop.f32.mrb[13].mxu1 }
 0x1d5   :  { %v491_v58 = vadd.f32 %v490_v57, %v2495_v45  ;;  %v1998_v60 = vpop.f32.mrb[14].mxu1 }
 0x1d6   :  { %v507_v61 = vmax.f32 %v499_v56, 0.0  ;;  %v502_v62 = vadd.f32 %v1998_v60, %v2501_v13  ;;  %v493_v63 = vpop.f32.mrb[15].mxu1 }
 0x1d7   :  { %v505_v0 = vmax.f32 %v491_v58, 0.0  ;;  %v494_v1 = vadd.f32 %v493_v63, %v2497_v9 }
 0x1d8   :  { %v511_v2 = vmax.f32 %v405_v48, %v507_v61  ;;  %v508_v3 = vmax.f32 %v502_v62, 0.0 }
 0x1d9   :  { %v509_v4 = vmax.f32 %v403_v51, %v505_v0  ;;  %v506_v5 = vmax.f32 %v494_v1, 0.0 }
 0x1da   :  { %v512_v6 = vmax.f32 %v406_v53, %v508_v3 }
 0x1db   :  { %v510_v7 = vmax.f32 %v404_v54, %v506_v5  ;;  %v2009_v8 = vpop.f32.mrb[16].mxu1 }
 0x1dc   :  { %v605_v49 = vadd.f32 %v2009_v8, %v2499_v12  ;;  %v596_v10 = vpop.f32.mrb[17].mxu1 }
 0x1dd   :  { %v597_v11 = vadd.f32 %v596_v10, %v2495_v45  ;;  %v2010_v37 = vpop.f32.mrb[18].mxu1 }
 0x1de   :  { %v613_v14 = vmax.f32 %v605_v49, 0.0  ;;  %v608_v15 = vadd.f32 %v2010_v37, %v2501_v13  ;;  %v599_v16 = vpop.f32.mrb[19].mxu1 }
 0x1df   :  { %v611_v59 = vmax.f32 %v597_v11, 0.0  ;;  %v600_v17 = vadd.f32 %v599_v16, %v2497_v9 }
 0x1e0   :  { %v617_v18 = vmax.f32 %v511_v2, %v613_v14  ;;  %v614_v19 = vmax.f32 %v608_v15, 0.0 }
 0x1e1   :  { %v615_v20 = vmax.f32 %v509_v4, %v611_v59  ;;  %v612_v21 = vmax.f32 %v600_v17, 0.0 }
 0x1e2   :  { %v618_v22 = vmax.f32 %v512_v6, %v614_v19 }
 0x1e3   :  { %v616_v23 = vmax.f32 %v510_v7, %v612_v21  ;;  %v2021_v24 = vpop.f32.mrb[20].mxu1 }
 0x1e4   :  { %v711_v25 = vadd.f32 %v2021_v24, %v2499_v12  ;;  %v702_v26 = vpop.f32.mrb[21].mxu1 }
 0x1e5   :  { %v703_v27 = vadd.f32 %v702_v26, %v2495_v45  ;;  %v2022_v28 = vpop.f32.mrb[22].mxu1 }
 0x1e6   :  { %v719_v29 = vmax.f32 %v711_v25, 0.0  ;;  %v714_v30 = vadd.f32 %v2022_v28, %v2501_v13  ;;  %v705_v31 = vpop.f32.mrb[23].mxu1 }
 0x1e7   :  { %v717_v32 = vmax.f32 %v703_v27, 0.0  ;;  %v706_v33 = vadd.f32 %v705_v31, %v2497_v9 }
 0x1e8   :  { %v723_v34 = vmax.f32 %v617_v18, %v719_v29  ;;  %v720_v35 = vmax.f32 %v714_v30, 0.0 }
 0x1e9   :  { %v721_v36 = vmax.f32 %v615_v20, %v717_v32  ;;  %v718_v38 = vmax.f32 %v706_v33, 0.0 }
 0x1ea   :  { %v724_v39 = vmax.f32 %v618_v22, %v720_v35 }
 0x1eb   :  { %v722_v40 = vmax.f32 %v616_v23, %v718_v38  ;;  %v2033_v41 = vpop.f32.mrb[24].mxu1 }
 0x1ec   :  { %v817_v42 = vadd.f32 %v2033_v41, %v2499_v12  ;;  %v808_v43 = vpop.f32.mrb[25].mxu1 }
 0x1ed   :  { %v809_v44 = vadd.f32 %v808_v43, %v2495_v45  ;;  %v2034_v46 = vpop.f32.mrb[26].mxu1 }
 0x1ee   :  { %v825_v47 = vmax.f32 %v817_v42, 0.0  ;;  %v820_v48 = vadd.f32 %v2034_v46, %v2501_v13  ;;  %v811_v50 = vpop.f32.mrb[27].mxu1 }
 0x1ef   :  { %v823_v51 = vmax.f32 %v809_v44, 0.0  ;;  %v812_v52 = vadd.f32 %v811_v50, %v2497_v9 }
 0x1f0   :  { %v829_v53 = vmax.f32 %v723_v34, %v825_v47  ;;  %v826_v54 = vmax.f32 %v820_v48, 0.0 }
 0x1f1   :  { %v827_v55 = vmax.f32 %v721_v36, %v823_v51  ;;  %v824_v56 = vmax.f32 %v812_v52, 0.0 }
 0x1f2   :  { %v830_v57 = vmax.f32 %v724_v39, %v826_v54 }
 0x1f3   :  { %v828_v58 = vmax.f32 %v722_v40, %v824_v56  ;;  %v2045_v60 = vpop.f32.mrb[28].mxu1 }
 0x1f4   :  { %v923_v61 = vadd.f32 %v2045_v60, %v2499_v12  ;;  %v914_v62 = vpop.f32.mrb[29].mxu1 }
 0x1f5   :  { %v915_v63 = vadd.f32 %v914_v62, %v2495_v45  ;;  %v2046_v0 = vpop.f32.mrb[30].mxu1 }
 0x1f6   :  { %v931_v1 = vmax.f32 %v923_v61, 0.0  ;;  %v926_v2 = vadd.f32 %v2046_v0, %v2501_v13  ;;  %v917_v3 = vpop.f32.mrb[31].mxu1 }
 0x1f7   :  { %v929_v4 = vmax.f32 %v915_v63, 0.0  ;;  %v918_v5 = vadd.f32 %v917_v3, %v2497_v9 }
 0x1f8   :  { %v935_v6 = vmax.f32 %v829_v53, %v931_v1  ;;  %v932_v7 = vmax.f32 %v926_v2, 0.0 }
 0x1f9   :  { %v933_v8 = vmax.f32 %v827_v55, %v929_v4  ;;  %v930_v49 = vmax.f32 %v918_v5, 0.0 }
 0x1fa   :  { %v936_v10 = vmax.f32 %v830_v57, %v932_v7 }
 0x1fb   :  { %v934_v11 = vmax.f32 %v828_v58, %v930_v49  ;;  %v2057_v37 = vpop.f32.mrb[32].mxu1 }
 0x1fc   :  { %v1029_v14 = vadd.f32 %v2057_v37, %v2499_v12  ;;  %v1020_v15 = vpop.f32.mrb[33].mxu1 }
 0x1fd   :  { %v1021_v16 = vadd.f32 %v1020_v15, %v2495_v45  ;;  %v2058_v59 = vpop.f32.mrb[34].mxu1 }
 0x1fe   :  { %v1037_v17 = vmax.f32 %v1029_v14, 0.0  ;;  %v1032_v18 = vadd.f32 %v2058_v59, %v2501_v13  ;;  %v1023_v19 = vpop.f32.mrb[35].mxu1 }
 0x1ff   :  { %v1035_v20 = vmax.f32 %v1021_v16, 0.0  ;;  %v1024_v21 = vadd.f32 %v1023_v19, %v2497_v9 }
 0x200   :  { %v1041_v22 = vmax.f32 %v935_v6, %v1037_v17  ;;  %v1038_v23 = vmax.f32 %v1032_v18, 0.0 }
 0x201   :  { %v1039_v24 = vmax.f32 %v933_v8, %v1035_v20  ;;  %v1036_v25 = vmax.f32 %v1024_v21, 0.0 }
 0x202   :  { %v1042_v26 = vmax.f32 %v936_v10, %v1038_v23 }
 0x203   :  { %v1040_v27 = vmax.f32 %v934_v11, %v1036_v25  ;;  %v2069_v28 = vpop.f32.mrb[36].mxu1 }
 0x204   :  { %v1135_v29 = vadd.f32 %v2069_v28, %v2499_v12  ;;  %v1126_v30 = vpop.f32.mrb[37].mxu1 }
 0x205   :  { %v1127_v31 = vadd.f32 %v1126_v30, %v2495_v45  ;;  %v2070_v32 = vpop.f32.mrb[38].mxu1 }
 0x206   :  { %v1143_v33 = vmax.f32 %v1135_v29, 0.0  ;;  %v1138_v34 = vadd.f32 %v2070_v32, %v2501_v13  ;;  %v1129_v35 = vpop.f32.mrb[39].mxu1 }
 0x207   :  { %v1141_v36 = vmax.f32 %v1127_v31, 0.0  ;;  %v1130_v38 = vadd.f32 %v1129_v35, %v2497_v9 }
 0x208   :  { %v1147_v39 = vmax.f32 %v1041_v22, %v1143_v33  ;;  %v1144_v40 = vmax.f32 %v1138_v34, 0.0 }
 0x209   :  { %v1145_v41 = vmax.f32 %v1039_v24, %v1141_v36  ;;  %v1142_v42 = vmax.f32 %v1130_v38, 0.0 }
 0x20a   :  { %v1148_v43 = vmax.f32 %v1042_v26, %v1144_v40 }
 0x20b   :  { %v1146_v44 = vmax.f32 %v1040_v27, %v1142_v42  ;;  %v2081_v46 = vpop.f32.mrb[40].mxu1 }
 0x20c   :  { %v1241_v47 = vadd.f32 %v2081_v46, %v2499_v12  ;;  %v1232_v48 = vpop.f32.mrb[41].mxu1 }
 0x20d   :  { %v1233_v50 = vadd.f32 %v1232_v48, %v2495_v45  ;;  %v2082_v51 = vpop.f32.mrb[42].mxu1 }
 0x20e   :  { %v1249_v52 = vmax.f32 %v1241_v47, 0.0  ;;  %v1244_v53 = vadd.f32 %v2082_v51, %v2501_v13  ;;  %v1235_v54 = vpop.f32.mrb[43].mxu1 }
 0x20f   :  { %v1247_v55 = vmax.f32 %v1233_v50, 0.0  ;;  %v1236_v56 = vadd.f32 %v1235_v54, %v2497_v9 }
 0x210   :  { %v1253_v57 = vmax.f32 %v1147_v39, %v1249_v52  ;;  %v1250_v58 = vmax.f32 %v1244_v53, 0.0 }
 0x211   :  { %v1251_v60 = vmax.f32 %v1145_v41, %v1247_v55  ;;  %v1248_v61 = vmax.f32 %v1236_v56, 0.0 }
 0x212   :  { %v1254_v62 = vmax.f32 %v1148_v43, %v1250_v58 }
 0x213   :  { %v1252_v63 = vmax.f32 %v1146_v44, %v1248_v61  ;;  %v2093_v0 = vpop.f32.mrb[44].mxu1 }
 0x214   :  { %v1347_v1 = vadd.f32 %v2093_v0, %v2499_v12  ;;  %v1338_v2 = vpop.f32.mrb[45].mxu1 }
 0x215   :  { %v1339_v3 = vadd.f32 %v1338_v2, %v2495_v45  ;;  %v2094_v4 = vpop.f32.mrb[46].mxu1 }
 0x216   :  { %v1355_v5 = vmax.f32 %v1347_v1, 0.0  ;;  %v1350_v6 = vadd.f32 %v2094_v4, %v2501_v13  ;;  %v1341_v7 = vpop.f32.mrb[47].mxu1 }
 0x217   :  { %v1353_v8 = vmax.f32 %v1339_v3, 0.0  ;;  %v1342_v49 = vadd.f32 %v1341_v7, %v2497_v9 }
 0x218   :  { %v1359_v10 = vmax.f32 %v1253_v57, %v1355_v5  ;;  %v1356_v11 = vmax.f32 %v1350_v6, 0.0 }
 0x219   :  { %v1357_v37 = vmax.f32 %v1251_v60, %v1353_v8  ;;  %v1354_v14 = vmax.f32 %v1342_v49, 0.0 }
 0x21a   :  { %v1360_v15 = vmax.f32 %v1254_v62, %v1356_v11 }
 0x21b   :  { %v1358_v16 = vmax.f32 %v1252_v63, %v1354_v14  ;;  %v2105_v59 = vpop.f32.mrb[48].mxu1 }
 0x21c   :  { %v1453_v17 = vadd.f32 %v2105_v59, %v2499_v12  ;;  %v1444_v18 = vpop.f32.mrb[49].mxu1 }
 0x21d   :  { %v1445_v19 = vadd.f32 %v1444_v18, %v2495_v45  ;;  %v2106_v20 = vpop.f32.mrb[50].mxu1 }
 0x21e   :  { %v1461_v21 = vmax.f32 %v1453_v17, 0.0  ;;  %v1456_v22 = vadd.f32 %v2106_v20, %v2501_v13  ;;  %v1447_v23 = vpop.f32.mrb[51].mxu1 }
 0x21f   :  { %v1459_v24 = vmax.f32 %v1445_v19, 0.0  ;;  %v1448_v25 = vadd.f32 %v1447_v23, %v2497_v9 }
 0x220   :  { %v1465_v26 = vmax.f32 %v1359_v10, %v1461_v21  ;;  %v1462_v27 = vmax.f32 %v1456_v22, 0.0 }
 0x221   :  { %v1463_v28 = vmax.f32 %v1357_v37, %v1459_v24  ;;  %v1460_v29 = vmax.f32 %v1448_v25, 0.0 }
 0x222   :  { %v1466_v30 = vmax.f32 %v1360_v15, %v1462_v27 }
 0x223   :  { %v1464_v31 = vmax.f32 %v1358_v16, %v1460_v29  ;;  %v2117_v32 = vpop.f32.mrb[52].mxu1 }
 0x224   :  { %v1559_v33 = vadd.f32 %v2117_v32, %v2499_v12  ;;  %v1550_v34 = vpop.f32.mrb[53].mxu1 }
 0x225   :  { %v1551_v35 = vadd.f32 %v1550_v34, %v2495_v45  ;;  %v2118_v36 = vpop.f32.mrb[54].mxu1 }
 0x226   :  { %v1567_v38 = vmax.f32 %v1559_v33, 0.0  ;;  %v1562_v39 = vadd.f32 %v2118_v36, %v2501_v13  ;;  %v1553_v40 = vpop.f32.mrb[55].mxu1 }
 0x227   :  { %v1565_v41 = vmax.f32 %v1551_v35, 0.0  ;;  %v1554_v42 = vadd.f32 %v1553_v40, %v2497_v9 }
 0x228   :  { %v1571_v43 = vmax.f32 %v1465_v26, %v1567_v38  ;;  %v1568_v44 = vmax.f32 %v1562_v39, 0.0 }
 0x229   :  { %v1569_v46 = vmax.f32 %v1463_v28, %v1565_v41  ;;  %v1566_v47 = vmax.f32 %v1554_v42, 0.0 }
 0x22a   :  { %v1572_v48 = vmax.f32 %v1466_v30, %v1568_v44 }
 0x22b   :  { %v1570_v50 = vmax.f32 %v1464_v31, %v1566_v47  ;;  %v2129_v51 = vpop.f32.mrb[56].mxu1 }
 0x22c   :  { %v1665_v52 = vadd.f32 %v2129_v51, %v2499_v12  ;;  %v1656_v53 = vpop.f32.mrb[57].mxu1 }
 0x22d   :  { %v1657_v54 = vadd.f32 %v1656_v53, %v2495_v45  ;;  %v2130_v55 = vpop.f32.mrb[58].mxu1 }
 0x22e   :  { %v1673_v56 = vmax.f32 %v1665_v52, 0.0  ;;  %v1668_v57 = vadd.f32 %v2130_v55, %v2501_v13  ;;  %v1659_v58 = vpop.f32.mrb[59].mxu1 }
 0x22f   :  { %v1671_v60 = vmax.f32 %v1657_v54, 0.0  ;;  %v1660_v61 = vadd.f32 %v1659_v58, %v2497_v9 }
 0x230   :  { %v1677_v62 = vmax.f32 %v1571_v43, %v1673_v56  ;;  %v1674_v63 = vmax.f32 %v1668_v57, 0.0 }
 0x231   :  { %v1675_v0 = vmax.f32 %v1569_v46, %v1671_v60  ;;  %v1672_v1 = vmax.f32 %v1660_v61, 0.0 }
 0x232   :  { %v1678_v2 = vmax.f32 %v1572_v48, %v1674_v63 }
 0x233   :  { %v1676_v3 = vmax.f32 %v1570_v50, %v1672_v1  ;;  %v2141_v4 = vpop.f32.mrb[60].mxu1 }
 0x234   :  { %v1771_v5 = vadd.f32 %v2141_v4, %v2499_v12  ;;  %v1762_v6 = vpop.f32.mrb[61].mxu1 }
 0x235   :  { %v1763_v7 = vadd.f32 %v1762_v6, %v2495_v45  ;;  %v2142_v8 = vpop.f32.mrb[62].mxu1 }
 0x236   :  { %v1779_v49 = vmax.f32 %v1771_v5, 0.0  ;;  %v1774_v10 = vadd.f32 %v2142_v8, %v2501_v13  ;;  %v1765_v11 = vpop.f32.mrb[63].mxu1 }
 0x237   :  { %v1777_v37 = vmax.f32 %v1763_v7, 0.0  ;;  %v1766_v14 = vadd.f32 %v1765_v11, %v2497_v9 }
 0x238   :  { %v1783_v15 = vmax.f32 %v1677_v62, %v1779_v49  ;;  %v1780_v16 = vmax.f32 %v1774_v10, 0.0 }
 0x239   :  { %v1781_v59 = vmax.f32 %v1675_v0, %v1777_v37  ;;  %v1778_v17 = vmax.f32 %v1766_v14, 0.0 }
 0x23a   :  { %1787 = vst [vmem:[#allocation2 + $0x10] sm:$0xff] %v1783_v15  ;;  %v1784_v18 = vmax.f32 %v1678_v2, %v1780_v16 }
 0x23b   :  { %1785 = vst [vmem:[#allocation2] sm:$0xff] %v1781_v59  ;;  %v1782_v12 = vmax.f32 %v1676_v3, %v1778_v17 }
 0x23c   :  { %1788 = vst [vmem:[#allocation2 + $0x18] sm:$0xff] %v1784_v18 }
 0x23d   :  { %1786 = vst [vmem:[#allocation2 + $0x8] sm:$0xff] %v1782_v12 }
 0x23e   :  { %2166 = shalt.err (!%p2163_p4)
}
 0x23f   :  { %s2167_s16 = scalar_lea.hbm %s2584_s5, 512 }
 0x240   :  { %p2168_p5 = scmp.ne.s32.totalorder %s2584_s5, %s2167_s16  ;;  %p2171_p6 = scmp.lt.u32.totalorder %s2167_s16, %s2584_s5 }
 0x242   :  { %p2173_p7 = pnand %p2171_p6, %p2168_p5 }
 0x244   :  { %2176 = shalt.err (!%p2173_p7)
}
 0x245   :  { %s2184_s21 = smov 128   ;;  %s2185_s22 = smov 8  }
 0x246   :  { %1800 = dma.vmem_to_hbm [thread:$0]  %s1795_s12, 512, %s2584_s5, [#allocation3], %s2184_s21, %s2184_s21, %s2185_s22  }
 0x247   :  { %2177 = dma.done.wait [#allocation3], 512  }
 0x248   :  { %2178 = vsyncadd [#allocation3], 4294966784 }
 0x249   :  { %1804 = vsyncpa [#allocation3], 1 }

</bundles_post_ra>
